<compile_context>
chip_gen: v5e
topology: v5e:2x2
jax: 0.10.0
libtpu: 0.0.40
codegen_flags: <defaults>
</compile_context>

<pallas_src>
import numpy as np
import jax
import jax.numpy as jnp
from jax.experimental import pallas as pl
from jax.experimental.pallas import tpu as pltpu


def _ddpm_trainer_kernel(a_ref, b_ref, x0_ref, noise_k_ref, temb_ref, yemb_ref,
                         noise_n_ref, w_ref, out_ref):
    """Grid = (N output blocks [parallel], K reduction blocks [arbitrary]).

    a_ref       : VMEM (B_pad, 1)  f32  sqrt(alphas_bar[t])        per-sample
    b_ref       : VMEM (B_pad, 1)  f32  sqrt(1 - alphas_bar[t])    per-sample
    x0_ref      : VMEM (B_pad, tk) f32  K-slice of flattened x_0
    noise_k_ref : VMEM (B_pad, tk) f32  K-slice of noise (q-sample)
    temb_ref    : VMEM (B_pad, tn) f32  N-slice of time embedding temb_table[t]
    yemb_ref    : VMEM (B_pad, tn) f32  N-slice of class embedding (0 if dropped)
    noise_n_ref : VMEM (B_pad, tn) f32  N-slice of noise (MSE target)
    w_ref       : VMEM (tk, tn)    bf16 weight tile of the synthetic eps model
    out_ref     : VMEM (B_pad, tn) f32  resident accumulator -> elementwise loss
    """
    k = pl.program_id(1)

    @pl.when(k == 0)
    def _():
        out_ref[...] = jnp.zeros_like(out_ref)

    # q-sample for this K-slice: x_t = sqrt_ab * x_0 + sqrt(1-ab) * noise  (VPU, f32)
    xt_k = a_ref[...] * x0_ref[...] + b_ref[...] * noise_k_ref[...]

    # --- synthetic eps model (stand-in for the diffusion UNet) ---
    # TODO(synk): the real eps-model is an external nn.Module passed into
    # __init__; replaced by a deterministic linear(+time/class embedding)+tanh
    # predictor so the diffusion math this module owns (q-sample + MSE) stays
    # exact.  MXU operands in bf16, accumulation in f32.
    out_ref[...] += jnp.dot(xt_k.astype(jnp.bfloat16), w_ref[...],
                            preferred_element_type=jnp.float32)

    @pl.when(k == pl.num_programs(1) - 1)
    def _():
        h = out_ref[...] + temb_ref[...] + yemb_ref[...]
        eps = jnp.tanh(h)
        d = eps - noise_n_ref[...]
        out_ref[...] = d * d        # F.mse_loss(eps, noise, reduction='none')


def make_trainer_buffers(beta_1, beta_T, T):
    """Same buffer math as the PyTorch __init__ (registered as .double()),
    cast to f32 at the end exactly like extract(...).float()."""
    betas = np.linspace(beta_1, beta_T, T, dtype=np.float64)
    alphas = 1.0 - betas
    alphas_bar = np.cumprod(alphas)
    sqrt_alphas_bar = np.sqrt(alphas_bar)
    sqrt_one_minus_alphas_bar = np.sqrt(1.0 - alphas_bar)
    return (sqrt_alphas_bar.astype(np.float32),
            sqrt_one_minus_alphas_bar.astype(np.float32))


def _vmem_budget_bytes():
    """Scoped-VMEM limit per generation: half of physical VMEM, capped at 64 MiB.
    v5e/v6e (128 MiB physical) -> 64 MiB, v7x (64 MiB) -> 32 MiB.  Falls back to
    the v7x-safe 32 MiB if the hardware query is unavailable."""
    try:
        cap = int(pltpu.get_tpu_info().vmem_capacity_bytes)
    except Exception:
        return 32 * 1024 * 1024
    return min(cap // 2, 64 * 1024 * 1024)


def _resident_bytes(B_pad, tk, tn, w_itemsize):
    """Total resident VMEM for one grid step (double-buffered pipeline blocks)."""
    f32 = 4
    wt = 2 * tk * tn * w_itemsize          # weight tile, double-buffered
    kblk = 2 * 2 * B_pad * tk * f32        # x0 + noise K-slices, double-buffered
    nblk = 2 * 3 * B_pad * tn * f32        # temb + yemb + MSE-noise N-slices
    out = 2 * B_pad * tn * f32             # resident accumulator / output block
    misc = 2 * 2 * B_pad * f32             # a, b (tiny)
    return wt + kblk + nblk + out + misc


def _choose_tiles(D, B_pad, w_itemsize, budget_bytes):
    """Pick (tn, tk): tile sizes that divide D, keep the full resident footprint
    within ~3/4 of the scoped-VMEM budget, and (when possible) give >= 2 N
    blocks so the "parallel" grid axis can use both v7x TensorCores."""
    cands = sorted({D} | {t for t in range(128, D, 128) if D % t == 0},
                   reverse=True)
    tn_prefs = [t for t in cands if t < D] or cands
    for tn in tn_prefs:
        for tk in cands:
            if _resident_bytes(B_pad, tk, tn, w_itemsize) <= (budget_bytes * 3) // 4:
                return tn, tk
    return cands[-1], cands[-1]


def gaussian_diffusion_trainer_loss(x_0, noise, t, yemb, temb, w,
                                    sqrt_alphas_bar, sqrt_one_minus_alphas_bar):
    """Pallas implementation of GaussianDiffusionTrainer.forward (the per-step
    eps-model call replaced by a synthetic linear+tanh).  Returns the
    elementwise DDPM loss with the same NCHW shape as x_0.

    `w` should be pre-cast to bf16 once by the caller (kept resident across
    training steps); casting here on every call would cost ~3x the kernel's
    own weight HBM traffic."""
    B, C, H, W = x_0.shape
    D = C * H * W

    if w.dtype != jnp.bfloat16:          # fallback only; callers should pre-cast
        w = w.astype(jnp.bfloat16)

    x0f = x_0.reshape(B, D).astype(jnp.float32)
    nzf = noise.reshape(B, D).astype(jnp.float32)
    # extract(v, t, x.shape): gather + .float() + broadcastable reshape
    a = sqrt_alphas_bar[t].astype(jnp.float32)[:, None]            # (B, 1)
    b = sqrt_one_minus_alphas_bar[t].astype(jnp.float32)[:, None]  # (B, 1)
    tembf = temb.astype(jnp.float32)
    yembf = yemb.astype(jnp.float32)

    # pad batch rows up to a multiple of 8 (full sublane utilization);
    # padded rows get a = b = 0 and are sliced off after the call.
    B_pad = max(8, ((B + 7) // 8) * 8)

    def pad(v):
        if v.shape[0] == B_pad:
            return v
        return jnp.concatenate(
            [v, jnp.zeros((B_pad - v.shape[0],) + v.shape[1:], v.dtype)], axis=0)

    budget = _vmem_budget_bytes()
    tn, tk = _choose_tiles(D, B_pad, w.dtype.itemsize, budget)
    assert D % tn == 0 and D % tk == 0

    grid_spec = pltpu.PrefetchScalarGridSpec(
        num_scalar_prefetch=0,
        grid=(D // tn, D // tk),                               # (N parallel, K reduce)
        in_specs=[
            pl.BlockSpec((B_pad, 1), lambda n, k: (0, 0)),     # sqrt_ab[t]
            pl.BlockSpec((B_pad, 1), lambda n, k: (0, 0)),     # sqrt_one_minus_ab[t]
            pl.BlockSpec((B_pad, tk), lambda n, k: (0, k)),    # x_0 K-slice
            pl.BlockSpec((B_pad, tk), lambda n, k: (0, k)),    # noise K-slice (q-sample)
            pl.BlockSpec((B_pad, tn), lambda n, k: (0, n)),    # temb[t] N-slice
            pl.BlockSpec((B_pad, tn), lambda n, k: (0, n)),    # yemb N-slice
            pl.BlockSpec((B_pad, tn), lambda n, k: (0, n)),    # noise N-slice (MSE)
            pl.BlockSpec((tk, tn), lambda n, k: (k, n)),       # weight tile (bf16)
        ],
        out_specs=pl.BlockSpec((B_pad, tn), lambda n, k: (0, n)),  # resident acc/loss
    )

    out = pl.pallas_call(
        _ddpm_trainer_kernel,
        out_shape=jax.ShapeDtypeStruct((B_pad, D), jnp.float32),
        grid_spec=grid_spec,
        compiler_params=pltpu.CompilerParams(
            dimension_semantics=("parallel", "arbitrary"),   # N across cores, K reduce
            vmem_limit_bytes=int(budget),                    # 64 MiB v5e/v6e, 32 MiB v7x
        ),
    )(pad(a), pad(b), pad(x0f), pad(nzf), pad(tembf), pad(yembf), pad(nzf), w)

    return out[:B].reshape(B, C, H, W)


def reference_loss(x_0, noise, t, yemb, temb, w,
                   sqrt_alphas_bar, sqrt_one_minus_alphas_bar):
    """Pure-JAX reference mirroring the kernel math (for correctness check).
    Note: the bf16 MXU operands differ from true f32 semantics at ~1e-2 rel."""
    B, C, H, W = x_0.shape
    D = C * H * W
    x0f = x_0.reshape(B, D).astype(jnp.float32)
    nzf = noise.reshape(B, D).astype(jnp.float32)
    a = sqrt_alphas_bar[t].astype(jnp.float32)[:, None]
    b = sqrt_one_minus_alphas_bar[t].astype(jnp.float32)[:, None]
    x_t = a * x0f + b * nzf
    h = jnp.dot(x_t.astype(jnp.bfloat16), w.astype(jnp.bfloat16),
                preferred_element_type=jnp.float32)
    eps = jnp.tanh(h + temb.astype(jnp.float32) + yemb.astype(jnp.float32))
    loss = (eps - nzf) ** 2
    return loss.reshape(B, C, H, W)


if __name__ == "__main__":
    # small shapes consistent with the module (img NCHW)
    B, C, H, W = 2, 4, 16, 16
    D = C * H * W
    T = 1000
    num_class = 10
    beta_1, beta_T = 1e-4, 0.02
    cfg = True

    sab_np, s1m_np = make_trainer_buffers(beta_1, beta_T, T)
    sqrt_ab = jnp.asarray(sab_np)
    sqrt_1m_ab = jnp.asarray(s1m_np)

    key = jax.random.PRNGKey(0)
    k_x, k_y, k_t, k_n, k_d, k_w, k_te, k_ye = jax.random.split(key, 8)

    x_0 = jax.random.normal(k_x, (B, C, H, W), dtype=jnp.float32)
    y_0 = jax.random.randint(k_y, (B,), 0, num_class)

    # module-internal torch randomness (t, noise, cfg label dropout) is sampled
    # here with explicit jax.random keys so the run is deterministic.  The cfg
    # dropout is one Bernoulli draw for the whole batch, matching the PyTorch
    # `if torch.rand(1)[0] < 1/10: y_l = None`.
    t = jax.random.randint(k_t, (B,), 0, T)
    noise = jax.random.normal(k_n, (B, C, H, W), dtype=jnp.float32)
    drop_labels = jax.random.uniform(k_d, ()) < (1.0 / 10.0) if cfg else False

    # deterministic synthetic "model" parameters (eps-predictor stand-in);
    # the weight is cast to bf16 ONCE here and kept resident (hoisted cast).
    w_f32 = jax.random.normal(k_w, (D, D), dtype=jnp.float32) * 0.02
    w_bf16 = w_f32.astype(jnp.bfloat16)
    temb_table = jax.random.normal(k_te, (T, D), dtype=jnp.float32) * 0.1
    yemb_table = jax.random.normal(k_ye, (num_class, D), dtype=jnp.float32) * 0.1

    temb = temb_table[t]                                              # (B, D)
    yemb = jnp.where(drop_labels, 0.0, 1.0) * yemb_table[y_0]         # y_l=None -> zero emb

    loss = gaussian_diffusion_trainer_loss(
        x_0, noise, t, yemb, temb, w_bf16, sqrt_ab, sqrt_1m_ab)
    loss = jax.block_until_ready(loss)

    ref = reference_loss(x_0, noise, t, yemb, temb, w_bf16, sqrt_ab, sqrt_1m_ab)
    assert loss.shape == (B, C, H, W) and loss.dtype == jnp.float32
    np.testing.assert_allclose(np.asarray(loss), np.asarray(ref),
                               atol=2e-2, rtol=2e-2)
    print("KERNEL_OK")
</pallas_src>

<mosaic_0001>
module attributes {stable_mosaic.version = 11 : i64} {
  func.func @_ddpm_trainer_kernel(%arg0: i32, %arg1: i32, %arg2: memref<8x1xf32, #tpu.memory_space<vmem>>, %arg3: memref<8x1xf32, #tpu.memory_space<vmem>>, %arg4: memref<8x1024xf32, #tpu.memory_space<vmem>>, %arg5: memref<8x1024xf32, #tpu.memory_space<vmem>>, %arg6: memref<8x512xf32, #tpu.memory_space<vmem>>, %arg7: memref<8x512xf32, #tpu.memory_space<vmem>>, %arg8: memref<8x512xf32, #tpu.memory_space<vmem>>, %arg9: memref<1024x512xbf16, #tpu.memory_space<vmem>>, %arg10: memref<8x512xf32, #tpu.memory_space<vmem>>) attributes {dimension_semantics = [#tpu.dimension_semantics<parallel>, #tpu.dimension_semantics<arbitrary>], iteration_bounds = array<i64: 2, 1>, scalar_prefetch = 0 : i64, scratch_operands = 0 : i64, tpu.core_type = #tpu.core_type<tc>, window_params = [{pipeline_mode = #tpu.pipeline_mode<synchronous>, transform_indices = @transform_0, window_bounds = array<i64: 8, 1>}, {pipeline_mode = #tpu.pipeline_mode<synchronous>, transform_indices = @transform_1, window_bounds = array<i64: 8, 1>}, {transform_indices = @transform_2, window_bounds = array<i64: 8, 1024>}, {transform_indices = @transform_3, window_bounds = array<i64: 8, 1024>}, {transform_indices = @transform_4, window_bounds = array<i64: 8, 512>}, {transform_indices = @transform_5, window_bounds = array<i64: 8, 512>}, {transform_indices = @transform_6, window_bounds = array<i64: 8, 512>}, {transform_indices = @transform_7, window_bounds = array<i64: 1024, 512>}, {transform_indices = @transform_8, window_bounds = array<i64: 8, 512>}]} {
    %c0_i32 = arith.constant 0 : i32
    %0 = arith.cmpi eq, %arg1, %c0_i32 : i32
    %1 = arith.extui %0 : i1 to i32
    %c0_i32_0 = arith.constant 0 : i32
    %2 = arith.cmpi ne, %1, %c0_i32_0 : i32
    scf.if %2 {
      %cst_16 = arith.constant 0.000000e+00 : f32
      %21 = vector.broadcast %cst_16 : f32 to vector<8x512xf32>
      %c0_17 = arith.constant 0 : index
      %c0_18 = arith.constant 0 : index
      %22 = vector.load %arg10[%c0_17, %c0_18] : memref<8x512xf32, #tpu.memory_space<vmem>>, vector<8x512xf32>
      tpu.vector_store %arg10[%c0_17, %c0_18], %21 {strides = array<i32>} : memref<8x512xf32, #tpu.memory_space<vmem>>, vector<8x512xf32>,
    } else {
    }
    %c0 = arith.constant 0 : index
    %c0_1 = arith.constant 0 : index
    %3 = vector.load %arg2[%c0, %c0_1] : memref<8x1xf32, #tpu.memory_space<vmem>>, vector<8x1xf32>
    %c0_2 = arith.constant 0 : index
    %c0_3 = arith.constant 0 : index
    %4 = vector.load %arg4[%c0_2, %c0_3] : memref<8x1024xf32, #tpu.memory_space<vmem>>, vector<8x1024xf32>
    %5 = vector.broadcast %3 : vector<8x1xf32> to vector<8x1024xf32>
    %6 = arith.mulf %5, %4 : vector<8x1024xf32>
    %c0_4 = arith.constant 0 : index
    %c0_5 = arith.constant 0 : index
    %7 = vector.load %arg3[%c0_4, %c0_5] : memref<8x1xf32, #tpu.memory_space<vmem>>, vector<8x1xf32>
    %c0_6 = arith.constant 0 : index
    %c0_7 = arith.constant 0 : index
    %8 = vector.load %arg5[%c0_6, %c0_7] : memref<8x1024xf32, #tpu.memory_space<vmem>>, vector<8x1024xf32>
    %9 = vector.broadcast %7 : vector<8x1xf32> to vector<8x1024xf32>
    %10 = arith.mulf %9, %8 : vector<8x1024xf32>
    %11 = arith.addf %6, %10 : vector<8x1024xf32>
    %c0_8 = arith.constant 0 : index
    %c0_9 = arith.constant 0 : index
    %12 = vector.load %arg10[%c0_8, %c0_9] : memref<8x512xf32, #tpu.memory_space<vmem>>, vector<8x512xf32>
    %13 = arith.truncf %11 : vector<8x1024xf32> to vector<8x1024xbf16>
    %c0_10 = arith.constant 0 : index
    %c0_11 = arith.constant 0 : index
    %14 = vector.load %arg9[%c0_10, %c0_11] : memref<1024x512xbf16, #tpu.memory_space<vmem>>, vector<1024x512xbf16>
    %cst = arith.constant dense<0.000000e+00> : vector<8x512xf32>
    %15 = tpu.matmul %13, %14, %cst {dimension_numbers = #tpu.dot_dimension_numbers<[1], [0], [0], [1], [0, 0, 1, 1], [], []>} : vector<8x1024xbf16>, vector<1024x512xbf16>, vector<8x512xf32> -> vector<8x512xf32>
    %16 = arith.addf %12, %15 : vector<8x512xf32>
    %c0_12 = arith.constant 0 : index
    %c0_13 = arith.constant 0 : index
    %17 = vector.load %arg10[%c0_12, %c0_13] : memref<8x512xf32, #tpu.memory_space<vmem>>, vector<8x512xf32>
    tpu.vector_store %arg10[%c0_12, %c0_13], %16 {strides = array<i32>} : memref<8x512xf32, #tpu.memory_space<vmem>>, vector<8x512xf32>,
    %c0_i32_14 = arith.constant 0 : i32
    %18 = arith.cmpi eq, %arg1, %c0_i32_14 : i32
    %19 = arith.extui %18 : i1 to i32
    %c0_i32_15 = arith.constant 0 : i32
    %20 = arith.cmpi ne, %19, %c0_i32_15 : i32
    scf.if %20 {
      %c0_16 = arith.constant 0 : index
      %c0_17 = arith.constant 0 : index
      %21 = vector.load %arg10[%c0_16, %c0_17] : memref<8x512xf32, #tpu.memory_space<vmem>>, vector<8x512xf32>
      %c0_18 = arith.constant 0 : index
      %c0_19 = arith.constant 0 : index
      %22 = vector.load %arg6[%c0_18, %c0_19] : memref<8x512xf32, #tpu.memory_space<vmem>>, vector<8x512xf32>
      %23 = arith.addf %21, %22 : vector<8x512xf32>
      %c0_20 = arith.constant 0 : index
      %c0_21 = arith.constant 0 : index
      %24 = vector.load %arg7[%c0_20, %c0_21] : memref<8x512xf32, #tpu.memory_space<vmem>>, vector<8x512xf32>
      %25 = arith.addf %23, %24 : vector<8x512xf32>
      %26 = math.tanh %25 : vector<8x512xf32>
      %c0_22 = arith.constant 0 : index
      %c0_23 = arith.constant 0 : index
      %27 = vector.load %arg8[%c0_22, %c0_23] : memref<8x512xf32, #tpu.memory_space<vmem>>, vector<8x512xf32>
      %28 = arith.subf %26, %27 : vector<8x512xf32>
      %29 = arith.mulf %28, %28 : vector<8x512xf32>
      %c0_24 = arith.constant 0 : index
      %c0_25 = arith.constant 0 : index
      %30 = vector.load %arg10[%c0_24, %c0_25] : memref<8x512xf32, #tpu.memory_space<vmem>>, vector<8x512xf32>
      tpu.vector_store %arg10[%c0_24, %c0_25], %29 {strides = array<i32>} : memref<8x512xf32, #tpu.memory_space<vmem>>, vector<8x512xf32>,
    } else {
    }
    return
  }
  func.func @transform_0(%arg0: i32, %arg1: i32) -> (i32, i32) {
    %c0_i32 = arith.constant 0 : i32
    %c0_i32_0 = arith.constant 0 : i32
    %c0_i32_1 = arith.constant 0 : i32
    return %c0_i32, %c0_i32_0 : i32, i32
  }
  func.func @transform_1(%arg0: i32, %arg1: i32) -> (i32, i32) {
    %c0_i32 = arith.constant 0 : i32
    %c0_i32_0 = arith.constant 0 : i32
    %c0_i32_1 = arith.constant 0 : i32
    return %c0_i32, %c0_i32_0 : i32, i32
  }
  func.func @transform_2(%arg0: i32, %arg1: i32) -> (i32, i32) {
    %c0_i32 = arith.constant 0 : i32
    %c0_i32_0 = arith.constant 0 : i32
    return %c0_i32, %arg1 : i32, i32
  }
  func.func @transform_3(%arg0: i32, %arg1: i32) -> (i32, i32) {
    %c0_i32 = arith.constant 0 : i32
    %c0_i32_0 = arith.constant 0 : i32
    return %c0_i32, %arg1 : i32, i32
  }
  func.func @transform_4(%arg0: i32, %arg1: i32) -> (i32, i32) {
    %c0_i32 = arith.constant 0 : i32
    %c0_i32_0 = arith.constant 0 : i32
    return %c0_i32, %arg0 : i32, i32
  }
  func.func @transform_5(%arg0: i32, %arg1: i32) -> (i32, i32) {
    %c0_i32 = arith.constant 0 : i32
    %c0_i32_0 = arith.constant 0 : i32
    return %c0_i32, %arg0 : i32, i32
  }
  func.func @transform_6(%arg0: i32, %arg1: i32) -> (i32, i32) {
    %c0_i32 = arith.constant 0 : i32
    %c0_i32_0 = arith.constant 0 : i32
    return %c0_i32, %arg0 : i32, i32
  }
  func.func @transform_7(%arg0: i32, %arg1: i32) -> (i32, i32) {
    %c0_i32 = arith.constant 0 : i32
    return %arg1, %arg0 : i32, i32
  }
  func.func @transform_8(%arg0: i32, %arg1: i32) -> (i32, i32) {
    %c0_i32 = arith.constant 0 : i32
    %c0_i32_0 = arith.constant 0 : i32
    return %c0_i32, %arg0 : i32, i32
  }
}

</mosaic_0001>

<bundles_post_ra>
// kernel: tpu_custom_call.1
= control target key start
LH: loop header
LB: loop body
LE: loop exit
PB: predicated region body
PF: predicated region fallthrough
CT: control target
= control target key end

     0   :  { %s5340_s0 = inlined_call_operand.vmem [shape: f32[8,1], index: 0, kind: input, shape index: {}]   ;;  %s5341_s1 = inlined_call_operand.vmem [shape: f32[8,1], index: 1, kind: input, shape index: {}]   ;;  %s5342_s2 = inlined_call_operand.hbm [shape: f32[8,1024], index: 2, kind: input, shape index: {}]   ;;  %s5343_s3 = inlined_call_operand.hbm [shape: f32[8,1024], index: 3, kind: input, shape index: {}]   ;;  %s5344_s4 = inlined_call_operand.hbm [shape: f32[8,1024], index: 4, kind: input, shape index: {}]   ;;  %s5345_s5 = inlined_call_operand.hbm [shape: f32[8,1024], index: 5, kind: input, shape index: {}]   ;;  %s5346_s6 = inlined_call_operand.hbm [shape: f32[8,1024], index: 6, kind: input, shape index: {}]   ;;  %s5347_s7 = inlined_call_operand.hbm [shape: bf16[1024,1024], index: 7, kind: input, shape index: {}]   ;;  %s5348_s8 = inlined_call_operand.hbm [shape: f32[8,1024], index: 8, kind: output, shape index: {}]  }
   0x1   :  { %5356 = sst [smem:[#allocation22_spill]] %s5342_s2 }
   0x2   :  { %5357 = sst [smem:[#allocation23_spill]] %s5344_s4 }
   0x3   :  { %5358 = sst [smem:[#allocation24_spill]] %s5348_s8 }
   0x4   :  { %13 = vsyncpa [#allocation3], 0 }
   0x5   :  { %14 = vsyncpa [#allocation6], 0 }
   0x6   :  { %15 = vsyncpa [#allocation4], 0 }
   0x7   :  { %17 = vsyncpa [#allocation4 + $0x1], 0  ;;  %s4512_s27 = smov 0   ;;  %s4514_s28 = smov 0  }
   0x8   :  { %s4516_s29 = smov 0   ;;  %s4518_s30 = smov 0  }
   0x9   :  { %s4520_s9 = smov 0   ;;  %s4522_s10 = smov 0  }
   0xa LB: > { %5359 = sst [smem:[#allocation16_spill]] %s4439_s27  ;;  %s4543_s11 = sadd.s32 4294967295, %s4459_s10   ;;  %s4459_s10 = sphi %s4522_s10, %s23_s10   ;;  %s4455_s9 = sphi %s4520_s9, %s5384_s9   ;;  %s4451_s30 = sphi %s4518_s30, %s5383_s30   ;;  %s4447_s29 = sphi %s4516_s29, %s5379_s29   ;;  %s4443_s28 = sphi %s4514_s28, %s5382_s28   ;;  %s4439_s27 = sphi %s4512_s27, %s5381_s27  }
   0xb   : > { %5360 = sst [smem:[#allocation17_spill]] %s4447_s29  ;;  %s2762_s12 = sadd.s32 4294967294, %s4459_s10  }
   0xc   : > { %s136_s13 = sadd.s32 1, %s4447_s29  ;;  %p143_p0 = scmp.ne.s32.totalorder %s4447_s29, %s4443_s28 }
   0xd   : > { %p149_p1 = scmp.ne.s32.totalorder %s4443_s28, %s4439_s27  ;;  %p150_p2 = scmp.eq.s32.totalorder %s4543_s11, 0 }
   0xe   : > { %p253_p3 = scmp.eq.s32.totalorder %s4543_s11, 1  ;;  %p259_p4 = scmp.eq.s32.totalorder %s2762_s12, 1 }
   0xf   : > { %p4555_p5 = por %p150_p2, %p149_p1  ;;  %p2763_p6 = scmp.ge.s32.totalorder %s4459_s10, 1 }
  0x10   : > { %p4563_p7 = por %p253_p3, %p143_p0  ;;  %p4567_p8 = por %p259_p4, %p149_p1 }
  0x11   : > { %p266_p9 = scmp.lt.s32.totalorder %s4459_s10, 3  ;;  %s5366_s2 = sld [smem:[#allocation22_spill]] }
  0x12   : > { %s5362_s15 = scalar_select %p4563_p7, 1, 0 }
  0x13   : > { %s5364_s16 = scalar_select %p4567_p8, 1, 0 }
  0x14   : > { %5363 = sst [smem:[#allocation18_spill]] %s5362_s15  ;;  %p4575_p10 = pnand %p2763_p6, %p266_p9 }
  0x15   : > { %5365 = sst [smem:[#allocation19_spill]] %s5364_s16  ;;  %s4461_s21 = smov [#allocation2]  }
  0x16   : > { %s289_s22 = sshll.u32 %s4461_s21, 4  ;;  %p2766_p11 = scmp.ge.s32.totalorder %s4459_s10, 2  ;;  %s290_s22 = int_to_ptr.vmem [resolvable:$true] %s289_s22 }
  0x17   : > { %s287_s19 = sshll.u32 %s5366_s2, 4  ;;  %p4095_p12 = pneg %p4575_p10  ;;  %s288_s19 = int_to_ptr.hbm [resolvable:$true] %s287_s19 }
  0x18   : > { %p144_p13 = scmp.eq.s32.totalorder %s4459_s10, 0  ;;  %s35_s24 = sadd.s32 1, %s4455_s9 }
  0x19   : > { %p4585_p1 = pnand %p4095_p12, %p150_p2  ;;  %p37_p4 = scmp.ge.s32.totalorder %s35_s24, 2 }
  0x1a   : > { %p4593_p3 = por %p144_p13, %p143_p0  ;;  %p4121_p6 = scmp.lt.s32.totalorder %s4459_s10, 2 }
  0x1b   : > { %4098 = dma.hbm_to_vmem [thread:$0]  (!%p4585_p1), %s288_s19, 1024, %s290_s22, [#allocation3]  }
  0x1c   : > { %s5386_s24 = smov (%p37_p4, %s35_s24), 0  ;;  %s315_s26 = sand.u32 1, %s4459_s10  }
  0x1d   : > { %5370 = sst [smem:[#allocation20_spill]] %s5386_s24  ;;  %s133_s12 = ssub.s32 %s4455_s9, %s5386_s24 }
  0x1e   : > { %p134_p9 = scmp.eq.s32.totalorder %s133_s12, 0  ;;  %s317_s17 = sand.u32 1, %s4447_s29  }
  0x1f   : > { %s2767_s18 = sshll.u32 %s317_s17, 5  ;;  %s3816_s21 = sshll.u32 %s4455_s9, 5 }
  0x20   : > { %s4610_s2 = scalar_select %p134_p9, %s4447_s29, %s136_s13  }
  0x21   : > { %s5372_s4 = sld [smem:[#allocation23_spill]]  ;;  %s319_s22 = scalar_lea.vmem [#allocation7], %s2767_s18 }
  0x22   : > { %5371 = sst [smem:[#allocation21_spill]] %s4610_s2  ;;  %s328_s8 = sshll.u32 %s319_s22, 4  ;;  %s329_s8 = int_to_ptr.vmem [resolvable:$true] %s328_s8 }
  0x23   : > { %p4619_p0 = pnand %p4121_p6, %p4593_p3  ;;  %s2776_s12 = sshll.u32 %s317_s17, 11 }
  0x24   : > { %s379_s13 = scalar_lea.vmem [#allocation10], %s2776_s12  ;;  %s4625_s27 = scalar_lea.sflag [#allocation3], %s315_s26 }
  0x25   : > { %s4623_s2 = sshll.u32 %s379_s13, 4  ;;  %s344_s25 = scalar_lea.hbm %s5345_s5, %s3816_s21  ;;  %s391_s2 = int_to_ptr.vmem [resolvable:$true] %s4623_s2 }
  0x26   : > { %s346_s22 = sshll.u32 %s344_s25, 4  ;;  %s364_s13 = scalar_lea.hbm %s5346_s6, %s3816_s21  ;;  %s347_s22 = int_to_ptr.hbm [resolvable:$true] %s346_s22 }
  0x27   : > { %s324_s15 = scalar_lea.hbm %s5372_s4, %s3816_s21  ;;  %s339_s4 = scalar_lea.vmem [#allocation8], %s2767_s18 }
  0x28   : > { %s326_s19 = sshll.u32 %s324_s15, 4  ;;  %s348_s17 = sshll.u32 %s339_s4, 4  ;;  %s327_s19 = int_to_ptr.hbm [resolvable:$true] %s326_s19  ;;  %s349_s17 = int_to_ptr.vmem [resolvable:$true] %s348_s17 }
  0x29   : > { %4105 = dma.hbm_to_vmem [thread:$0]  (!%p4619_p0), %s327_s19, 512, %s329_s8, %s4625_s27  }
  0x2a   : > { %4108 = dma.hbm_to_vmem [thread:$0]  (!%p4619_p0), %s347_s22, 512, %s349_s17, %s4625_s27  }
  0x2b   : > { %s366_s29 = sshll.u32 %s364_s13, 4  ;;  %s359_s8 = scalar_lea.vmem [#allocation9], %s2767_s18  ;;  %s367_s29 = int_to_ptr.hbm [resolvable:$true] %s366_s29 }
  0x2c   : > { %s368_s19 = sshll.u32 %s359_s8, 4  ;;  %s302_s16 = sshll.u32 %s5343_s3, 4  ;;  %s369_s19 = int_to_ptr.vmem [resolvable:$true] %s368_s19  ;;  %s303_s16 = int_to_ptr.hbm [resolvable:$true] %s302_s16 }
  0x2d   : > { %4111 = dma.hbm_to_vmem [thread:$0]  (!%p4619_p0), %s367_s29, 512, %s369_s19, %s4625_s27  }
  0x2e   : > { %s4462_s25 = smov [#allocation5]   ;;  %s3819_s17 = sshll.u32 %s4455_s9, 4 }
  0x2f   : > { %s304_s22 = sshll.u32 %s4462_s25, 4  ;;  %s387_s26 = scalar_lea.hbm %s5347_s7, %s3819_s17  ;;  %s305_s22 = int_to_ptr.vmem [resolvable:$true] %s304_s22 }
  0x30   : > { %4101 = dma.hbm_to_vmem [thread:$0]  (!%p4585_p1), %s303_s16, 1024, %s305_s22, [#allocation6]  }
  0x31   : > { %s388_s12 = sshll.u32 %s387_s26, 4  ;;  %s4463_s13 = smov 512   ;;  %s389_s12 = int_to_ptr.hbm [resolvable:$true] %s388_s12 }
  0x32   : > { %s4464_s8 = smov 256   ;;  %s4465_s29 = smov 16  }
  0x33   : > { %4114 = dma.hbm_to_vmem [thread:$0]  (!%p4619_p0), %s389_s12, 32768, %s391_s2, %s4625_s27, %s4463_s13, %s4464_s8, %s4465_s29  }
  0x34   : > { %402 = sbr.rel (%p4575_p10) target bundleno = 543 (0x21f), region = 52 }
  0x39   : > { %4422 = dma.done.wait (%p150_p2), [#allocation3], 1024  }
  0x3a   : > { %4424 = vsyncadd (%p150_p2), [#allocation3], 4294966272 }
  0x3b   : > { %4426 = dma.done.wait (%p150_p2), [#allocation6], 1024  }
  0x3c   : > { %4428 = vsyncadd (%p150_p2), [#allocation6], 4294966272  ;;  %s414_s23 = sand.u32 1, %s4543_s11   ;;  %s4669_s2 = sand.u32 1, %s4443_s28  }
  0x3d   : > { %s4672_s20 = sshll.u32 %s4669_s2, 5  ;;  %s415_s24 = scalar_lea.sflag [#allocation3], %s414_s23 }
  0x3e   : > { %s4675_s27 = scalar_lea.vmem [#allocation7], %s4672_s20 }
  0x3f   : > { %4430 = dma.done.wait (%p4555_p5), %s415_s24, 34304  }
  0x40   : > { %4432 = vsyncadd (%p4555_p5), %s415_s24, 4294932992  ;;  %v4466_v0 = vmov 0   ;;  %s2785_s19 = sshll.u32 %s4669_s2, 11  ;;  %v513_v1 = vld [vmem:[%s5340_s0] sm:$0xff]  ;;  %s5226_s25 = scalar_lea.vmem [#allocation8], %s4672_s20 }
  0x41   : > { %4180 = vset.pattern.permute.xlu0 %v4466_v0  ;;  %s4685_s15 = scalar_lea.vmem [#allocation10], %s2785_s19  ;;  %v535_v15 = vld [vmem:[%s5341_s1] sm:$0xff]  ;;  %s5252_s22 = scalar_lea.vmem [#allocation9], %s4672_s20 }
  0x42   : > { %v2901_v2 = vld [vmem:[%s4685_s15 + $0xe0] sm:$0xf]  ;;  %524 = vperm.xlu0 %4180, %v513_v1   ;;  %v3850_v3 = vld [vmem:[%s4685_s15 + $0xec] sm:$0xf0]  ;;  %s5272_s17 = scalar_lea.vmem [#allocation11], %s4672_s20  ;;  %s4076_s18 = sshll.u32 %s4451_s30, 5 }
  0x43   : > { %v3029_v4 = vld [vmem:[%s4685_s15 + $0x1e0] sm:$0xf]  ;;  %v3882_v5 = vld [vmem:[%s4685_s15 + $0x1ec] sm:$0xf0]  ;;  %v2902_v6 = vor.u32 %v3850_v3, %v2901_v2  ;;  %s5374_s12 = sld [smem:[#allocation24_spill]]  ;;  %s2594_s29 = sshll.u32 %s5272_s17, 4  ;;  %s2595_s29 = int_to_ptr.vmem [resolvable:$true] %s2594_s29 }
  0x44   : > { %v3030_v7 = vor.u32 %v3882_v5, %v3029_v4  ;;  %v3157_v8 = vld [vmem:[%s4685_s15 + $0x2e0] sm:$0xf]  ;;  %v3914_v9 = vld [vmem:[%s4685_s15 + $0x2ec] sm:$0xf0]  ;;  %s2581_s20 = scalar_lea.sflag [#allocation4], %s4669_s2 }
  0x45   : > { %v3285_v10 = vld [vmem:[%s4685_s15 + $0x3e0] sm:$0xf]  ;;  %v3158_v11 = vor.u32 %v3914_v9, %v3157_v8  ;;  %v3946_v12 = vld [vmem:[%s4685_s15 + $0x3ec] sm:$0xf0]  ;;  %2113 = vmatpush.bf16.msra.mxu0 %v2902_v6 }
  0x46   : > { %v2885_v13 = vld [vmem:[%s4685_s15 + $0xc0] sm:$0xf]  ;;  %v3846_v14 = vld [vmem:[%s4685_s15 + $0xcc] sm:$0xf0]  ;;  %2126 = vmatpush.bf16.msra.mxu1 %v3030_v7  ;;  %v3286_v16 = vor.u32 %v3946_v12, %v3285_v10 }
  0x47   : > { %v2886_v17 = vor.u32 %v3846_v14, %v2885_v13  ;;  %v3013_v18 = vld [vmem:[%s4685_s15 + $0x1c0] sm:$0xf]  ;;  %v3878_v19 = vld [vmem:[%s4685_s15 + $0x1cc] sm:$0xf0]  ;;  %2139 = vmatpush.bf16.msra.mxu2 %v3158_v11 }
  0x48   : > { %v3141_v20 = vld [vmem:[%s4685_s15 + $0x2c0] sm:$0xf]  ;;  %v3014_v21 = vor.u32 %v3878_v19, %v3013_v18  ;;  %v3910_v22 = vld [vmem:[%s4685_s15 + $0x2cc] sm:$0xf0]  ;;  %2152 = vmatpush.bf16.msra.mxu3 %v3286_v16 }
  0x49   : > { %v3269_v23 = vld [vmem:[%s4685_s15 + $0x3c0] sm:$0xf]  ;;  %v3942_v24 = vld [vmem:[%s4685_s15 + $0x3cc] sm:$0xf0]  ;;  %v3142_v25 = vor.u32 %v3910_v22, %v3141_v20  ;;  %2114 = vmatpush.bf16.msra.mxu0 %v2886_v17  ;;  %s2592_s8 = scalar_lea.hbm %s5374_s12, %s4076_s18  ;;  %s4389_s4 = scalar_lea.hbm %s5374_s12, 64 }
  0x4a   : > { %v3270_v26 = vor.u32 %v3942_v24, %v3269_v23  ;;  %v2869_v27 = vld [vmem:[%s4685_s15 + $0xa0] sm:$0xf]  ;;  %v3842_v28 = vld [vmem:[%s4685_s15 + $0xac] sm:$0xf0]  ;;  %2127 = vmatpush.bf16.msra.mxu1 %v3014_v21  ;;  %546 = vperm.xlu0 %4180, %v535_v15   ;;  %s2596_s23 = sshll.u32 %s2592_s8, 4  ;;  %s2597_s23 = int_to_ptr.hbm [resolvable:$true] %s2596_s23 }
  0x4b   : > { %v2997_v29 = vld [vmem:[%s4685_s15 + $0x1a0] sm:$0xf]  ;;  %v3874_v30 = vld [vmem:[%s4685_s15 + $0x1ac] sm:$0xf0]  ;;  %v2870_v33 = vor.u32 %v3842_v28, %v2869_v27  ;;  %2140 = vmatpush.bf16.msra.mxu2 %v3142_v25  ;;  %s4383_s24 = sshra.s32 %s2597_s23, 4  ;;  %s4384_s24 = int_to_ptr.hbm [resolvable:$true] %s4383_s24 }
  0x4c   : > { %v3125_v31 = vld [vmem:[%s4685_s15 + $0x2a0] sm:$0xf]  ;;  %v3906_v32 = vld [vmem:[%s4685_s15 + $0x2ac] sm:$0xf0]  ;;  %v2998_v34 = vor.u32 %v3874_v30, %v2997_v29  ;;  %2153 = vmatpush.bf16.msra.mxu3 %v3270_v26  ;;  %p4390_p12 = scmp.lt.s32.totalorder %s4384_s24, %s5374_s12 }
  0x4d   : > { %v3253_v35 = vld [vmem:[%s4685_s15 + $0x3a0] sm:$0xf]  ;;  %v3938_v36 = vld [vmem:[%s4685_s15 + $0x3ac] sm:$0xf0]  ;;  %v3126_v38 = vor.u32 %v3906_v32, %v3125_v31  ;;  %2115 = vmatpush.bf16.msra.mxu0 %v2870_v33 }
  0x4e   : > { %v2853_v37 = vld [vmem:[%s4685_s15 + $0x80] sm:$0xf]  ;;  %v3838_v39 = vld [vmem:[%s4685_s15 + $0x8c] sm:$0xf0]  ;;  %v3254_v42 = vor.u32 %v3938_v36, %v3253_v35  ;;  %2128 = vmatpush.bf16.msra.mxu1 %v2998_v34 }
  0x4f   : > { %v2981_v40 = vld [vmem:[%s4685_s15 + $0x180] sm:$0xf]  ;;  %v3870_v41 = vld [vmem:[%s4685_s15 + $0x18c] sm:$0xf0]  ;;  %v2854_v47 = vor.u32 %v3838_v39, %v2853_v37  ;;  %2141 = vmatpush.bf16.msra.mxu2 %v3126_v38 }
  0x50   : > { %v3109_v43 = vld [vmem:[%s4685_s15 + $0x280] sm:$0xf]  ;;  %v3902_v44 = vld [vmem:[%s4685_s15 + $0x28c] sm:$0xf0]  ;;  %v2982_v48 = vor.u32 %v3870_v41, %v2981_v40  ;;  %2154 = vmatpush.bf16.msra.mxu3 %v3254_v42 }
  0x51   : > { %v3237_v45 = vld [vmem:[%s4685_s15 + $0x380] sm:$0xf]  ;;  %v3934_v46 = vld [vmem:[%s4685_s15 + $0x38c] sm:$0xf0]  ;;  %v3110_v50 = vor.u32 %v3902_v44, %v3109_v43  ;;  %2116 = vmatpush.bf16.msra.mxu0 %v2854_v47 }
  0x52   : > { %v2837_v49 = vld [vmem:[%s4685_s15 + $0x60] sm:$0xf]  ;;  %v3834_v51 = vld [vmem:[%s4685_s15 + $0x6c] sm:$0xf0]  ;;  %v3238_v54 = vor.u32 %v3934_v46, %v3237_v45  ;;  %2129 = vmatpush.bf16.msra.mxu1 %v2982_v48 }
  0x53   : > { %v2965_v52 = vld [vmem:[%s4685_s15 + $0x160] sm:$0xf]  ;;  %v3866_v53 = vld [vmem:[%s4685_s15 + $0x16c] sm:$0xf0]  ;;  %v2838_v59 = vor.u32 %v3834_v51, %v2837_v49  ;;  %2142 = vmatpush.bf16.msra.mxu2 %v3110_v50 }
  0x54   : > { %v3093_v55 = vld [vmem:[%s4685_s15 + $0x260] sm:$0xf]  ;;  %v3898_v56 = vld [vmem:[%s4685_s15 + $0x26c] sm:$0xf0]  ;;  %v2966_v60 = vor.u32 %v3866_v53, %v2965_v52  ;;  %2155 = vmatpush.bf16.msra.mxu3 %v3238_v54 }
  0x55   : > { %v3221_v57 = vld [vmem:[%s4685_s15 + $0x360] sm:$0xf]  ;;  %v3930_v58 = vld [vmem:[%s4685_s15 + $0x36c] sm:$0xf0]  ;;  %v3094_v62 = vor.u32 %v3898_v56, %v3093_v55  ;;  %2117 = vmatpush.bf16.msra.mxu0 %v2838_v59 }
  0x56   : > { %v2821_v61 = vld [vmem:[%s4685_s15 + $0x40] sm:$0xf]  ;;  %v3830_v63 = vld [vmem:[%s4685_s15 + $0x4c] sm:$0xf0]  ;;  %v3222_v2 = vor.u32 %v3930_v58, %v3221_v57  ;;  %2130 = vmatpush.bf16.msra.mxu1 %v2966_v60 }
  0x57   : > { %v2949_v0 = vld [vmem:[%s4685_s15 + $0x140] sm:$0xf]  ;;  %v3862_v1 = vld [vmem:[%s4685_s15 + $0x14c] sm:$0xf0]  ;;  %v2822_v7 = vor.u32 %v3830_v63, %v2821_v61  ;;  %2143 = vmatpush.bf16.msra.mxu2 %v3094_v62 }
  0x58   : > { %v3077_v3 = vld [vmem:[%s4685_s15 + $0x240] sm:$0xf]  ;;  %v3894_v4 = vld [vmem:[%s4685_s15 + $0x24c] sm:$0xf0]  ;;  %v2950_v8 = vor.u32 %v3862_v1, %v2949_v0  ;;  %2156 = vmatpush.bf16.msra.mxu3 %v3222_v2 }
  0x59   : > { %v3205_v5 = vld [vmem:[%s4685_s15 + $0x340] sm:$0xf]  ;;  %v3926_v6 = vld [vmem:[%s4685_s15 + $0x34c] sm:$0xf0]  ;;  %v3078_v10 = vor.u32 %v3894_v4, %v3077_v3  ;;  %2118 = vmatpush.bf16.msra.mxu0 %v2822_v7 }
  0x5a   : > { %v2805_v9 = vld [vmem:[%s4685_s15 + $0x20] sm:$0xf]  ;;  %v3826_v11 = vld [vmem:[%s4685_s15 + $0x2c] sm:$0xf0]  ;;  %v3206_v14 = vor.u32 %v3926_v6, %v3205_v5  ;;  %2131 = vmatpush.bf16.msra.mxu1 %v2950_v8 }
  0x5b   : > { %v2933_v12 = vld [vmem:[%s4685_s15 + $0x120] sm:$0xf]  ;;  %v3858_v13 = vld [vmem:[%s4685_s15 + $0x12c] sm:$0xf0]  ;;  %v2806_v20 = vor.u32 %v3826_v11, %v2805_v9  ;;  %2144 = vmatpush.bf16.msra.mxu2 %v3078_v10 }
  0x5c   : > { %v3061_v15 = vld [vmem:[%s4685_s15 + $0x220] sm:$0xf]  ;;  %v3890_v16 = vld [vmem:[%s4685_s15 + $0x22c] sm:$0xf0]  ;;  %v2934_v21 = vor.u32 %v3858_v13, %v2933_v12  ;;  %2157 = vmatpush.bf16.msra.mxu3 %v3206_v14 }
  0x5d   : > { %v3189_v17 = vld [vmem:[%s4685_s15 + $0x320] sm:$0xf]  ;;  %v3922_v18 = vld [vmem:[%s4685_s15 + $0x32c] sm:$0xf0]  ;;  %v3062_v25 = vor.u32 %v3890_v16, %v3061_v15  ;;  %2119 = vmatpush.bf16.msra.mxu0 %v2806_v20 }
  0x5e   : > { %v2789_v19 = vld [vmem:[%s4685_s15] sm:$0xf]  ;;  %v3822_v22 = vld [vmem:[%s4685_s15 + $0xc] sm:$0xf0]  ;;  %v3190_v29 = vor.u32 %v3922_v18, %v3189_v17  ;;  %2132 = vmatpush.bf16.msra.mxu1 %v2934_v21 }
  0x5f   : > { %v2917_v23 = vld [vmem:[%s4685_s15 + $0x100] sm:$0xf]  ;;  %v3854_v24 = vld [vmem:[%s4685_s15 + $0x10c] sm:$0xf0]  ;;  %v2790_v36 = vor.u32 %v3822_v22, %v2789_v19  ;;  %2145 = vmatpush.bf16.msra.mxu2 %v3062_v25 }
  0x60   : > { %v3045_v26 = vld [vmem:[%s4685_s15 + $0x200] sm:$0xf]  ;;  %v3886_v27 = vld [vmem:[%s4685_s15 + $0x20c] sm:$0xf0]  ;;  %v2918_v37 = vor.u32 %v3854_v24, %v2917_v23  ;;  %2158 = vmatpush.bf16.msra.mxu3 %v3190_v29 }
  0x61   : > { %v3173_v28 = vld [vmem:[%s4685_s15 + $0x300] sm:$0xf]  ;;  %v3918_v30 = vld [vmem:[%s4685_s15 + $0x30c] sm:$0xf0]  ;;  %v3046_v41 = vor.u32 %v3886_v27, %v3045_v26  ;;  %2120 = vmatpush.bf16.msra.mxu0 %v2790_v36 }
  0x62   : > { %v3413_v31 = vld [vmem:[%s4685_s15 + $0x4e0] sm:$0xf]  ;;  %v3978_v32 = vld [vmem:[%s4685_s15 + $0x4ec] sm:$0xf0]  ;;  %v3174_v43 = vor.u32 %v3918_v30, %v3173_v28  ;;  %2133 = vmatpush.bf16.msra.mxu1 %v2918_v37 }
  0x63   : > { %v3541_v33 = vld [vmem:[%s4685_s15 + $0x5e0] sm:$0xf]  ;;  %v4010_v34 = vld [vmem:[%s4685_s15 + $0x5ec] sm:$0xf0]  ;;  %v3414_v42 = vor.u32 %v3978_v32, %v3413_v31  ;;  %2146 = vmatpush.bf16.msra.mxu2 %v3046_v41 }
  0x64   : > { %v3669_v35 = vld [vmem:[%s4685_s15 + $0x6e0] sm:$0xf]  ;;  %v4042_v38 = vld [vmem:[%s4685_s15 + $0x6ec] sm:$0xf0]  ;;  %v3542_v44 = vor.u32 %v4010_v34, %v3541_v33  ;;  %2159 = vmatpush.bf16.msra.mxu3 %v3174_v43 }
  0x65   : > { %v3797_v39 = vld [vmem:[%s4685_s15 + $0x7e0] sm:$0xf]  ;;  %v4074_v40 = vld [vmem:[%s4685_s15 + $0x7ec] sm:$0xf0]  ;;  %v3670_v47 = vor.u32 %v4042_v38, %v3669_v35  ;;  %2165 = vmatpush.bf16.msrb.mxu0 %v3414_v42 }
  0x66   : > { %v3397_v45 = vld [vmem:[%s4685_s15 + $0x4c0] sm:$0xf]  ;;  %v3974_v46 = vld [vmem:[%s4685_s15 + $0x4cc] sm:$0xf0]  ;;  %v3798_v48 = vor.u32 %v4074_v40, %v3797_v39  ;;  %2178 = vmatpush.bf16.msrb.mxu1 %v3542_v44 }
  0x67   : > { %v3525_v49 = vld [vmem:[%s4685_s15 + $0x5c0] sm:$0xf]  ;;  %v4006_v50 = vld [vmem:[%s4685_s15 + $0x5cc] sm:$0xf0]  ;;  %v3398_v55 = vor.u32 %v3974_v46, %v3397_v45  ;;  %2191 = vmatpush.bf16.msrb.mxu2 %v3670_v47 }
  0x68   : > { %v3653_v51 = vld [vmem:[%s4685_s15 + $0x6c0] sm:$0xf]  ;;  %v4038_v52 = vld [vmem:[%s4685_s15 + $0x6cc] sm:$0xf0]  ;;  %v3526_v56 = vor.u32 %v4006_v50, %v3525_v49  ;;  %2204 = vmatpush.bf16.msrb.mxu3 %v3798_v48 }
  0x69   : > { %v3781_v53 = vld [vmem:[%s4685_s15 + $0x7c0] sm:$0xf]  ;;  %v4070_v54 = vld [vmem:[%s4685_s15 + $0x7cc] sm:$0xf0]  ;;  %v3654_v59 = vor.u32 %v4038_v52, %v3653_v51  ;;  %2166 = vmatpush.bf16.msrb.mxu0 %v3398_v55 }
  0x6a   : > { %v3381_v57 = vld [vmem:[%s4685_s15 + $0x4a0] sm:$0xf]  ;;  %v3970_v58 = vld [vmem:[%s4685_s15 + $0x4ac] sm:$0xf0]  ;;  %v3782_v60 = vor.u32 %v4070_v54, %v3781_v53  ;;  %2179 = vmatpush.bf16.msrb.mxu1 %v3526_v56 }
  0x6b   : > { %v3509_v61 = vld [vmem:[%s4685_s15 + $0x5a0] sm:$0xf]  ;;  %v4002_v62 = vld [vmem:[%s4685_s15 + $0x5ac] sm:$0xf0]  ;;  %v3382_v3 = vor.u32 %v3970_v58, %v3381_v57  ;;  %2192 = vmatpush.bf16.msrb.mxu2 %v3654_v59 }
  0x6c   : > { %v3637_v63 = vld [vmem:[%s4685_s15 + $0x6a0] sm:$0xf]  ;;  %v4034_v0 = vld [vmem:[%s4685_s15 + $0x6ac] sm:$0xf0]  ;;  %v3510_v4 = vor.u32 %v4002_v62, %v3509_v61  ;;  %2205 = vmatpush.bf16.msrb.mxu3 %v3782_v60 }
  0x6d   : > { %v3765_v1 = vld [vmem:[%s4685_s15 + $0x7a0] sm:$0xf]  ;;  %v4066_v2 = vld [vmem:[%s4685_s15 + $0x7ac] sm:$0xf0]  ;;  %v3638_v7 = vor.u32 %v4034_v0, %v3637_v63  ;;  %2167 = vmatpush.bf16.msrb.mxu0 %v3382_v3 }
  0x6e   : > { %v3365_v5 = vld [vmem:[%s4685_s15 + $0x480] sm:$0xf]  ;;  %v3966_v6 = vld [vmem:[%s4685_s15 + $0x48c] sm:$0xf0]  ;;  %v3766_v8 = vor.u32 %v4066_v2, %v3765_v1  ;;  %2180 = vmatpush.bf16.msrb.mxu1 %v3510_v4 }
  0x6f   : > { %v3493_v9 = vld [vmem:[%s4685_s15 + $0x580] sm:$0xf]  ;;  %v3998_v10 = vld [vmem:[%s4685_s15 + $0x58c] sm:$0xf0]  ;;  %v3366_v15 = vor.u32 %v3966_v6, %v3365_v5  ;;  %2193 = vmatpush.bf16.msrb.mxu2 %v3638_v7  ;;  %v515_v5 = vld [vmem:[#allocation2 + $0x8] sm:$0xff] }
  0x70   : > { %v3621_v11 = vld [vmem:[%s4685_s15 + $0x680] sm:$0xf]  ;;  %v4030_v12 = vld [vmem:[%s4685_s15 + $0x68c] sm:$0xf0]  ;;  %v3494_v16 = vor.u32 %v3998_v10, %v3493_v9  ;;  %2206 = vmatpush.bf16.msrb.mxu3 %v3766_v8  ;;  %v517_v8 = vld [vmem:[#allocation2 + $0x18] sm:$0xff] }
  0x71   : > { %v3749_v13 = vld [vmem:[%s4685_s15 + $0x780] sm:$0xf]  ;;  %v4062_v14 = vld [vmem:[%s4685_s15 + $0x78c] sm:$0xf0]  ;;  %v3622_v17 = vor.u32 %v4030_v12, %v3621_v11  ;;  %2168 = vmatpush.bf16.msrb.mxu0 %v3366_v15  ;;  %v537_v9 = vld [vmem:[#allocation5 + $0x8] sm:$0xff] }
  0x72   : > { %v3750_v18 = vor.u32 %v4062_v14, %v3749_v13  ;;  %2181 = vmatpush.bf16.msrb.mxu1 %v3494_v16  ;;  %v3349_v19 = vld [vmem:[%s4685_s15 + $0x460] sm:$0xf]  ;;  %v3962_v20 = vld [vmem:[%s4685_s15 + $0x46c] sm:$0xf0]  ;;  %v539_v11 = vld [vmem:[#allocation5 + $0x18] sm:$0xff] }
  0x73   : > { %2194 = vmatpush.bf16.msrb.mxu2 %v3622_v17  ;;  %v3477_v21 = vld [vmem:[%s4685_s15 + $0x560] sm:$0xf]  ;;  %v3350_v22 = vor.u32 %v3962_v20, %v3349_v19  ;;  %v3994_v23 = vld [vmem:[%s4685_s15 + $0x56c] sm:$0xf0]  ;;  %v3848_v17 = vld [vmem:[%s4685_s15 + $0xe4] sm:$0xf] }
  0x74   : > { %2207 = vmatpush.bf16.msrb.mxu3 %v3750_v18  ;;  %v3605_v24 = vld [vmem:[%s4685_s15 + $0x660] sm:$0xf]  ;;  %v4026_v25 = vld [vmem:[%s4685_s15 + $0x66c] sm:$0xf0]  ;;  %v3478_v26 = vor.u32 %v3994_v23, %v3477_v21  ;;  %v3880_v23 = vld [vmem:[%s4685_s15 + $0x1e4] sm:$0xf] }
  0x75   : > { %v3606_v27 = vor.u32 %v4026_v25, %v3605_v24  ;;  %v3733_v28 = vld [vmem:[%s4685_s15 + $0x760] sm:$0xf]  ;;  %v4058_v29 = vld [vmem:[%s4685_s15 + $0x76c] sm:$0xf0]  ;;  %2169 = vmatpush.bf16.msrb.mxu0 %v3350_v22  ;;  %v2903_v22 = vld [vmem:[%s4685_s15 + $0xf0] sm:$0xf0] }
  0x76   : > { %v3333_v30 = vld [vmem:[%s4685_s15 + $0x440] sm:$0xf]  ;;  %v3734_v31 = vor.u32 %v4058_v29, %v3733_v28  ;;  %v3958_v32 = vld [vmem:[%s4685_s15 + $0x44c] sm:$0xf0]  ;;  %2182 = vmatpush.bf16.msrb.mxu1 %v3478_v26  ;;  %v3031_v24 = vld [vmem:[%s4685_s15 + $0x1f0] sm:$0xf0] }
  0x77   : > { %v3461_v33 = vld [vmem:[%s4685_s15 + $0x540] sm:$0xf]  ;;  %v3990_v34 = vld [vmem:[%s4685_s15 + $0x54c] sm:$0xf0]  ;;  %2195 = vmatpush.bf16.msrb.mxu2 %v3606_v27  ;;  %v3334_v35 = vor.u32 %v3958_v32, %v3333_v30  ;;  %v3912_v25 = vld [vmem:[%s4685_s15 + $0x2e4] sm:$0xf] }
  0x78   : > { %v3462_v36 = vor.u32 %v3990_v34, %v3461_v33  ;;  %v3589_v37 = vld [vmem:[%s4685_s15 + $0x640] sm:$0xf]  ;;  %v4022_v38 = vld [vmem:[%s4685_s15 + $0x64c] sm:$0xf0]  ;;  %2208 = vmatpush.bf16.msrb.mxu3 %v3734_v31  ;;  %v3159_v30 = vld [vmem:[%s4685_s15 + $0x2f0] sm:$0xf0]  ;;  %v2906_v33 = vor.u32 %v3848_v17, %v2903_v22  ;;  %v3034_v34 = vor.u32 %v3880_v23, %v3031_v24 }
  0x79   : > { %v3717_v39 = vld [vmem:[%s4685_s15 + $0x740] sm:$0xf]  ;;  %v3590_v40 = vor.u32 %v4022_v38, %v3589_v37  ;;  %v4054_v41 = vld [vmem:[%s4685_s15 + $0x74c] sm:$0xf0]  ;;  %2170 = vmatpush.bf16.msrb.mxu0 %v3334_v35  ;;  %v3944_v31 = vld [vmem:[%s4685_s15 + $0x3e4] sm:$0xf] }
  0x7a   : > { %v3718_v42 = vor.u32 %v4054_v41, %v3717_v39  ;;  %2183 = vmatpush.bf16.msrb.mxu1 %v3462_v36  ;;  %v3317_v43 = vld [vmem:[%s4685_s15 + $0x420] sm:$0xf]  ;;  %v3954_v44 = vld [vmem:[%s4685_s15 + $0x42c] sm:$0xf0]  ;;  %v3287_v32 = vld [vmem:[%s4685_s15 + $0x3f0] sm:$0xf0]  ;;  %v3162_v41 = vor.u32 %v3912_v25, %v3159_v30 }
  0x7b   : > { %2196 = vmatpush.bf16.msrb.mxu2 %v3590_v40  ;;  %v3445_v45 = vld [vmem:[%s4685_s15 + $0x520] sm:$0xf]  ;;  %v3318_v46 = vor.u32 %v3954_v44, %v3317_v43  ;;  %v3986_v47 = vld [vmem:[%s4685_s15 + $0x52c] sm:$0xf0]  ;;  %v3844_v39 = vld [vmem:[%s4685_s15 + $0xc4] sm:$0xf] }
  0x7c   : > { %2209 = vmatpush.bf16.msrb.mxu3 %v3718_v42  ;;  %v3573_v48 = vld [vmem:[%s4685_s15 + $0x620] sm:$0xf]  ;;  %v4018_v49 = vld [vmem:[%s4685_s15 + $0x62c] sm:$0xf0]  ;;  %v3446_v50 = vor.u32 %v3986_v47, %v3445_v45  ;;  %v2887_v40 = vld [vmem:[%s4685_s15 + $0xd0] sm:$0xf0]  ;;  %v3290_v42 = vor.u32 %v3944_v31, %v3287_v32 }
  0x7d   : > { %v3574_v51 = vor.u32 %v4018_v49, %v3573_v48  ;;  %v3701_v52 = vld [vmem:[%s4685_s15 + $0x720] sm:$0xf]  ;;  %v4050_v53 = vld [vmem:[%s4685_s15 + $0x72c] sm:$0xf0]  ;;  %2171 = vmatpush.bf16.msrb.mxu0 %v3318_v46  ;;  %v3876_v43 = vld [vmem:[%s4685_s15 + $0x1c4] sm:$0xf] }
  0x7e   : > { %v3301_v54 = vld [vmem:[%s4685_s15 + $0x400] sm:$0xf]  ;;  %v3702_v55 = vor.u32 %v4050_v53, %v3701_v52  ;;  %v3950_v56 = vld [vmem:[%s4685_s15 + $0x40c] sm:$0xf0]  ;;  %2184 = vmatpush.bf16.msrb.mxu1 %v3446_v50  ;;  %v3015_v44 = vld [vmem:[%s4685_s15 + $0x1d0] sm:$0xf0]  ;;  %v2890_v52 = vor.u32 %v3844_v39, %v2887_v40 }
  0x7f   : > { %v3429_v57 = vld [vmem:[%s4685_s15 + $0x500] sm:$0xf]  ;;  %v3982_v58 = vld [vmem:[%s4685_s15 + $0x50c] sm:$0xf0]  ;;  %2197 = vmatpush.bf16.msrb.mxu2 %v3574_v51  ;;  %v3302_v59 = vor.u32 %v3950_v56, %v3301_v54  ;;  %v3908_v45 = vld [vmem:[%s4685_s15 + $0x2c4] sm:$0xf]  ;;  %v3018_v53 = vor.u32 %v3876_v43, %v3015_v44 }
  0x80   : > { %v3430_v60 = vor.u32 %v3982_v58, %v3429_v57  ;;  %v3557_v61 = vld [vmem:[%s4685_s15 + $0x600] sm:$0xf]  ;;  %v4014_v62 = vld [vmem:[%s4685_s15 + $0x60c] sm:$0xf0]  ;;  %2210 = vmatpush.bf16.msrb.mxu3 %v3702_v55  ;;  %v3143_v46 = vld [vmem:[%s4685_s15 + $0x2d0] sm:$0xf0] }
  0x81   : > { %v3685_v63 = vld [vmem:[%s4685_s15 + $0x700] sm:$0xf]  ;;  %v3558_v0 = vor.u32 %v4014_v62, %v3557_v61  ;;  %v4046_v1 = vld [vmem:[%s4685_s15 + $0x70c] sm:$0xf0]  ;;  %2172 = vmatpush.bf16.msrb.mxu0 %v3302_v59  ;;  %v3940_v47 = vld [vmem:[%s4685_s15 + $0x3c4] sm:$0xf]  ;;  %v3146_v57 = vor.u32 %v3908_v45, %v3143_v46 }
  0x82   : > { %v3686_v2 = vor.u32 %v4046_v1, %v3685_v63  ;;  %2185 = vmatpush.bf16.msrb.mxu1 %v3430_v60  ;;  %v514_v4 = vld [vmem:[#allocation2] sm:$0xff]  ;;  %v516_v7 = vld [vmem:[#allocation2 + $0x10] sm:$0xff]  ;;  %v541_v51 = vld [vmem:[#allocation5 + $0x28] sm:$0xff] }
  0x83   : > { %2198 = vmatpush.bf16.msrb.mxu2 %v3558_v0  ;;  %v536_v6 = vld [vmem:[#allocation5] sm:$0xff]  ;;  %v538_v10 = vld [vmem:[#allocation5 + $0x10] sm:$0xff]  ;;  %v519_v62 = vld [vmem:[#allocation2 + $0x28] sm:$0xff] }
  0x84   : > { %2211 = vmatpush.bf16.msrb.mxu3 %v3686_v2  ;;  %v3271_v48 = vld [vmem:[%s4685_s15 + $0x3d0] sm:$0xf0]  ;;  %v3840_v49 = vld [vmem:[%s4685_s15 + $0xa4] sm:$0xf]  ;;  %v543_v2 = vld [vmem:[#allocation5 + $0x38] sm:$0xff] }
  0x85   : > { %v540_v50 = vld [vmem:[#allocation5 + $0x20] sm:$0xff]  ;;  %v2871_v54 = vld [vmem:[%s4685_s15 + $0xb0] sm:$0xf0]  ;;  %v3274_v58 = vor.u32 %v3940_v47, %v3271_v48 }
  0x86   : > { %v3872_v55 = vld [vmem:[%s4685_s15 + $0x1a4] sm:$0xf]  ;;  %v2999_v56 = vld [vmem:[%s4685_s15 + $0x1b0] sm:$0xf0] }
  0x87   : > { %v3904_v59 = vld [vmem:[%s4685_s15 + $0x2a4] sm:$0xf]  ;;  %v3127_v60 = vld [vmem:[%s4685_s15 + $0x2b0] sm:$0xf0] }
  0x88   : > { %v518_v61 = vld [vmem:[#allocation2 + $0x20] sm:$0xff]  ;;  %v542_v63 = vld [vmem:[#allocation5 + $0x30] sm:$0xff] }
  0x89   : > { %v3936_v0 = vld [vmem:[%s4685_s15 + $0x3a4] sm:$0xf]  ;;  %v3255_v1 = vld [vmem:[%s4685_s15 + $0x3b0] sm:$0xf0] }
  0x8a   : > { %v3900_v17 = vld [vmem:[%s4685_s15 + $0x284] sm:$0xf]  ;;  %v3239_v22 = vld [vmem:[%s4685_s15 + $0x390] sm:$0xf0] }
  0x8b   : > { %v2839_v32 = vld [vmem:[%s4685_s15 + $0x70] sm:$0xf0]  ;;  %v3928_v43 = vld [vmem:[%s4685_s15 + $0x364] sm:$0xf] }
  0x8c   : > { %v3223_v44 = vld [vmem:[%s4685_s15 + $0x370] sm:$0xf0] }
  0xb4   : > { %v4818_v3 = vpop.permute.xlu0 %524 }
  0xb5   : > { %v527_v13 = vmul.f32 %v4818_v3, %v514_v4  ;;  %v528_v14 = vmul.f32 %v4818_v3, %v515_v5  ;;  %v529_v15 = vmul.f32 %v4818_v3, %v516_v7  ;;  %v530_v16 = vmul.f32 %v4818_v3, %v517_v8  ;;  %v520_v7 = vld [vmem:[#allocation2 + $0x30] sm:$0xff]  ;;  %v521_v8 = vld [vmem:[#allocation2 + $0x38] sm:$0xff] }
  0xb6   : > { %v2874_v4 = vor.u32 %v3840_v49, %v2871_v54  ;;  %v3002_v5 = vor.u32 %v3872_v55, %v2999_v56  ;;  %v531_v23 = vmul.f32 %v4818_v3, %v518_v61  ;;  %v532_v24 = vmul.f32 %v4818_v3, %v519_v62  ;;  %v3860_v55 = vld [vmem:[%s4685_s15 + $0x144] sm:$0xf]  ;;  %v2951_v56 = vld [vmem:[%s4685_s15 + $0x150] sm:$0xf0] }
  0xb7   : > { %v3226_v54 = vor.u32 %v3928_v43, %v3223_v44  ;;  %v2954_v62 = vor.u32 %v3860_v55, %v2951_v56  ;;  %v4004_v43 = vld [vmem:[%s4685_s15 + $0x5c4] sm:$0xf]  ;;  %v3527_v44 = vld [vmem:[%s4685_s15 + $0x5d0] sm:$0xf0] }
  0xb8   : > { %v3968_v55 = vld [vmem:[%s4685_s15 + $0x4a4] sm:$0xf]  ;;  %v3383_v56 = vld [vmem:[%s4685_s15 + $0x4b0] sm:$0xf0] }
  0xbc   : > { %v4820_v12 = vpop.permute.xlu0 %546 }
  0xbd   : > { %v549_v18 = vmul.f32 %v4820_v12, %v536_v6  ;;  %v550_v19 = vmul.f32 %v4820_v12, %v537_v9  ;;  %v551_v20 = vmul.f32 %v4820_v12, %v538_v10  ;;  %v552_v21 = vmul.f32 %v4820_v12, %v539_v11  ;;  %v3836_v6 = vld [vmem:[%s4685_s15 + $0x84] sm:$0xf]  ;;  %v2855_v10 = vld [vmem:[%s4685_s15 + $0x90] sm:$0xf0] }
  0xbe   : > { %v3130_v9 = vor.u32 %v3904_v59, %v3127_v60  ;;  %v3868_v11 = vld [vmem:[%s4685_s15 + $0x184] sm:$0xf]  ;;  %v2858_v25 = vor.u32 %v3836_v6, %v2855_v10  ;;  %v3207_v60 = vld [vmem:[%s4685_s15 + $0x350] sm:$0xf0] }
  0xbf   : > { %v557_v26 = vadd.f32 %v549_v18, %v527_v13  ;;  %v558_v27 = vadd.f32 %v550_v19, %v528_v14  ;;  %v559_v28 = vadd.f32 %v551_v20, %v529_v15  ;;  %v560_v29 = vadd.f32 %v552_v21, %v530_v16  ;;  %v2983_v13 = vld [vmem:[%s4685_s15 + $0x190] sm:$0xf0]  ;;  %v3932_v21 = vld [vmem:[%s4685_s15 + $0x384] sm:$0xf] }
  0xc0   : > { %v553_v14 = vmul.f32 %v4820_v12, %v540_v50  ;;  %v554_v15 = vmul.f32 %v4820_v12, %v541_v51  ;;  %v3258_v16 = vor.u32 %v3936_v0, %v3255_v1  ;;  %v3111_v18 = vld [vmem:[%s4685_s15 + $0x290] sm:$0xf0]  ;;  %v555_v19 = vmul.f32 %v4820_v12, %v542_v63  ;;  %v3828_v50 = vld [vmem:[%s4685_s15 + $0x44] sm:$0xf] }
  0xc1   : > { %v4838_v35 = vpack.c.bf16 %v557_v26, %v557_v26  ;;  %v4840_v36 = vpack.c.bf16 %v558_v27, %v558_v27  ;;  %v4842_v37 = vpack.c.bf16 %v559_v28, %v559_v28  ;;  %v4844_v38 = vpack.c.bf16 %v560_v29, %v560_v29  ;;  %v3832_v29 = vld [vmem:[%s4685_s15 + $0x64] sm:$0xf]  ;;  %v2823_v51 = vld [vmem:[%s4685_s15 + $0x50] sm:$0xf0] }
  0xc2   : > { %v556_v20 = vmul.f32 %v4820_v12, %v543_v2  ;;  %v2986_v26 = vor.u32 %v3868_v11, %v2983_v13  ;;  %v533_v27 = vmul.f32 %v4818_v3, %v520_v7  ;;  %v534_v28 = vmul.f32 %v4818_v3, %v521_v8  ;;  %v3896_v3 = vld [vmem:[%s4685_s15 + $0x264] sm:$0xf]  ;;  %v2807_v0 = vld [vmem:[%s4685_s15 + $0x30] sm:$0xf0] }
  0xc3   : > { %2121 = vmatmul.bf16.vlgmr.msra.gmra.mxu0 %v4838_v35  ;;  %2134 = vmatmul.bf16.vlgmr.msra.gmra.mxu1 %v4840_v36  ;;  %v3114_v12 = vor.u32 %v3900_v17, %v3111_v18  ;;  %v561_v30 = vadd.f32 %v553_v14, %v531_v23  ;;  %v562_v31 = vadd.f32 %v554_v15, %v532_v24  ;;  %v3924_v59 = vld [vmem:[%s4685_s15 + $0x344] sm:$0xf]  ;;  %v3063_v7 = vld [vmem:[%s4685_s15 + $0x230] sm:$0xf0] }
  0xc4   : > { %2147 = vmatmul.bf16.vlgmr.msra.gmra.mxu2 %v4842_v37  ;;  %2160 = vmatmul.bf16.vlgmr.msra.gmra.mxu3 %v4844_v38  ;;  %v3242_v39 = vor.u32 %v3932_v21, %v3239_v22  ;;  %v563_v40 = vadd.f32 %v555_v19, %v533_v27  ;;  %v2842_v45 = vor.u32 %v3832_v29, %v2839_v32  ;;  %v3824_v63 = vld [vmem:[%s4685_s15 + $0x24] sm:$0xf]  ;;  %v2791_v14 = vld [vmem:[%s4685_s15 + $0x10] sm:$0xf0] }
  0xc5   : > { %2217 = vmatpush.bf16.msra.mxu0 %v2906_v33  ;;  %2230 = vmatpush.bf16.msra.mxu1 %v3034_v34  ;;  %v3864_v33 = vld [vmem:[%s4685_s15 + $0x164] sm:$0xf]  ;;  %v2967_v34 = vld [vmem:[%s4685_s15 + $0x170] sm:$0xf0]  ;;  %v4890_v47 = vpack.c.bf16 %v561_v30, %v561_v30  ;;  %v4892_v48 = vpack.c.bf16 %v562_v31, %v562_v31  ;;  %v2826_v61 = vor.u32 %v3828_v50, %v2823_v51 }
  0xc6   : > { %2243 = vmatpush.bf16.msra.mxu2 %v3162_v41  ;;  %2256 = vmatpush.bf16.msra.mxu3 %v3290_v42  ;;  %v564_v41 = vadd.f32 %v556_v20, %v534_v28  ;;  %v3095_v42 = vld [vmem:[%s4685_s15 + $0x270] sm:$0xf0]  ;;  %v2970_v46 = vor.u32 %v3864_v33, %v2967_v34  ;;  %v3210_v2 = vor.u32 %v3924_v59, %v3207_v60  ;;  %v3888_v6 = vld [vmem:[%s4685_s15 + $0x224] sm:$0xf] }
  0xc7   : > { %v3098_v49 = vor.u32 %v3896_v3, %v3095_v42  ;;  %v3920_v8 = vld [vmem:[%s4685_s15 + $0x324] sm:$0xf]  ;;  %v2810_v11 = vor.u32 %v3824_v63, %v2807_v0  ;;  %v3066_v17 = vor.u32 %v3888_v6, %v3063_v7  ;;  %v3047_v20 = vld [vmem:[%s4685_s15 + $0x210] sm:$0xf0] }
  0xc8   : > { %v3820_v10 = vld [vmem:[%s4685_s15 + $0x4] sm:$0xf]  ;;  %v3175_v22 = vld [vmem:[%s4685_s15 + $0x310] sm:$0xf0] }
  0xc9   : > { %2218 = vmatpush.bf16.msra.mxu0 %v2890_v52  ;;  %2231 = vmatpush.bf16.msra.mxu1 %v3018_v53  ;;  %v4896_v52 = vpack.c.bf16 %v563_v40, %v563_v40  ;;  %v4898_v53 = vpack.c.bf16 %v564_v41, %v564_v41  ;;  %v3852_v15 = vld [vmem:[%s4685_s15 + $0x104] sm:$0xf]  ;;  %v3415_v24 = vld [vmem:[%s4685_s15 + $0x4f0] sm:$0xf0]  ;;  %v2794_v28 = vor.u32 %v3820_v10, %v2791_v14 }
  0xca   : > { %2244 = vmatpush.bf16.msra.mxu2 %v3146_v57  ;;  %2257 = vmatpush.bf16.msra.mxu3 %v3274_v58  ;;  %v3892_v57 = vld [vmem:[%s4685_s15 + $0x244] sm:$0xf]  ;;  %v3079_v58 = vld [vmem:[%s4685_s15 + $0x250] sm:$0xf0] }
  0xcb   : > { %v3082_v1 = vor.u32 %v3892_v57, %v3079_v58  ;;  %v3884_v19 = vld [vmem:[%s4685_s15 + $0x204] sm:$0xf]  ;;  %v3799_v31 = vld [vmem:[%s4685_s15 + $0x7f0] sm:$0xf0] }
  0xcc   : > { %v3916_v21 = vld [vmem:[%s4685_s15 + $0x304] sm:$0xf]  ;;  %v3050_v32 = vor.u32 %v3884_v19, %v3047_v20  ;;  %v3399_v41 = vld [vmem:[%s4685_s15 + $0x4d0] sm:$0xf0] }
  0xcd   : > { %2219 = vmatpush.bf16.msra.mxu0 %v2874_v4  ;;  %2232 = vmatpush.bf16.msra.mxu1 %v3002_v5  ;;  %v3856_v4 = vld [vmem:[%s4685_s15 + $0x124] sm:$0xf]  ;;  %v2935_v5 = vld [vmem:[%s4685_s15 + $0x130] sm:$0xf0]  ;;  %v3178_v33 = vor.u32 %v3916_v21, %v3175_v22 }
  0xce   : > { %2245 = vmatpush.bf16.msra.mxu2 %v3130_v9  ;;  %2258 = vmatpush.bf16.msra.mxu3 %v3258_v16  ;;  %v3191_v9 = vld [vmem:[%s4685_s15 + $0x330] sm:$0xf0]  ;;  %v2938_v13 = vor.u32 %v3856_v4, %v2935_v5  ;;  %v3976_v23 = vld [vmem:[%s4685_s15 + $0x4e4] sm:$0xf] }
  0xcf   : > { %v2919_v16 = vld [vmem:[%s4685_s15 + $0x110] sm:$0xf0]  ;;  %v3194_v18 = vor.u32 %v3920_v8, %v3191_v9  ;;  %v4040_v27 = vld [vmem:[%s4685_s15 + $0x6e4] sm:$0xf]  ;;  %v3418_v34 = vor.u32 %v3976_v23, %v3415_v24 }
  0xd0   : > { %v2922_v29 = vor.u32 %v3852_v15, %v2919_v16  ;;  %v4072_v30 = vld [vmem:[%s4685_s15 + $0x7e4] sm:$0xf]  ;;  %v3783_v50 = vld [vmem:[%s4685_s15 + $0x7d0] sm:$0xf0] }
  0xd1   : > { %2220 = vmatpush.bf16.msra.mxu0 %v2858_v25  ;;  %2233 = vmatpush.bf16.msra.mxu1 %v2986_v26  ;;  %v4008_v25 = vld [vmem:[%s4685_s15 + $0x5e4] sm:$0xf]  ;;  %v3543_v26 = vld [vmem:[%s4685_s15 + $0x5f0] sm:$0xf0]  ;;  %v3802_v42 = vor.u32 %v4072_v30, %v3799_v31 }
  0xd2   : > { %2246 = vmatpush.bf16.msra.mxu2 %v3114_v12  ;;  %2259 = vmatpush.bf16.msra.mxu3 %v3242_v39  ;;  %v3671_v12 = vld [vmem:[%s4685_s15 + $0x6f0] sm:$0xf0]  ;;  %v3546_v39 = vor.u32 %v4008_v25, %v3543_v26  ;;  %v3972_v40 = vld [vmem:[%s4685_s15 + $0x4c4] sm:$0xf] }
  0xd3   : > { %2173 = vmatmul.bf16.vlgmr.msrb.gmra.mxu0 %v4890_v47  ;;  %2186 = vmatmul.bf16.vlgmr.msrb.gmra.mxu1 %v4892_v48  ;;  %v3674_v3 = vor.u32 %v4040_v27, %v3671_v12  ;;  %v3402_v51 = vor.u32 %v3972_v40, %v3399_v41  ;;  %v4000_v59 = vld [vmem:[%s4685_s15 + $0x5a4] sm:$0xf]  ;;  %v3511_v60 = vld [vmem:[%s4685_s15 + $0x5b0] sm:$0xf0] }
  0xd4   : > { %2199 = vmatmul.bf16.vlgmr.msrb.gmra.mxu2 %v4896_v52  ;;  %2212 = vmatmul.bf16.vlgmr.msrb.gmra.mxu3 %v4898_v53  ;;  %v4064_v63 = vld [vmem:[%s4685_s15 + $0x7a4] sm:$0xf]  ;;  %v3767_v0 = vld [vmem:[%s4685_s15 + $0x7b0] sm:$0xf0] }
  0xd5   : > { %2221 = vmatpush.bf16.msra.mxu0 %v2842_v45  ;;  %2234 = vmatpush.bf16.msra.mxu1 %v2970_v46  ;;  %v4036_v45 = vld [vmem:[%s4685_s15 + $0x6c4] sm:$0xf]  ;;  %v3655_v46 = vld [vmem:[%s4685_s15 + $0x6d0] sm:$0xf0]  ;;  %v3770_v7 = vor.u32 %v4064_v63, %v3767_v0 }
  0xd6   : > { %2247 = vmatpush.bf16.msra.mxu2 %v3098_v49  ;;  %2260 = vmatpush.bf16.msra.mxu3 %v3226_v54  ;;  %v4068_v49 = vld [vmem:[%s4685_s15 + $0x7c4] sm:$0xf]  ;;  %v3530_v54 = vor.u32 %v4004_v43, %v3527_v44  ;;  %v3658_v57 = vor.u32 %v4036_v45, %v3655_v46  ;;  %v3367_v5 = vld [vmem:[%s4685_s15 + $0x490] sm:$0xf0] }
  0xd7   : > { %v3786_v58 = vor.u32 %v4068_v49, %v3783_v50  ;;  %v3964_v4 = vld [vmem:[%s4685_s15 + $0x484] sm:$0xf]  ;;  %v3495_v9 = vld [vmem:[%s4685_s15 + $0x590] sm:$0xf0] }
  0xd8   : > { %v3996_v8 = vld [vmem:[%s4685_s15 + $0x584] sm:$0xf]  ;;  %v3751_v14 = vld [vmem:[%s4685_s15 + $0x790] sm:$0xf0]  ;;  %v3370_v15 = vor.u32 %v3964_v4, %v3367_v5 }
  0xd9   : > { %2222 = vmatpush.bf16.msra.mxu0 %v2826_v61  ;;  %2235 = vmatpush.bf16.msra.mxu1 %v2954_v62  ;;  %v4032_v61 = vld [vmem:[%s4685_s15 + $0x6a4] sm:$0xf]  ;;  %v3639_v62 = vld [vmem:[%s4685_s15 + $0x6b0] sm:$0xf0]  ;;  %v3498_v16 = vor.u32 %v3996_v8, %v3495_v9  ;;  %v3037_v8 = vld [vmem:[%s4685_s15 + $0x1e8] sm:$0xf] }
  0xda   : > { %2248 = vmatpush.bf16.msra.mxu2 %v3082_v1  ;;  %2261 = vmatpush.bf16.msra.mxu3 %v3210_v2  ;;  %v3386_v1 = vor.u32 %v3968_v55, %v3383_v56  ;;  %v3514_v2 = vor.u32 %v4000_v59, %v3511_v60  ;;  %v3642_v6 = vor.u32 %v4032_v61, %v3639_v62  ;;  %v4028_v10 = vld [vmem:[%s4685_s15 + $0x684] sm:$0xf]  ;;  %v3479_v22 = vld [vmem:[%s4685_s15 + $0x570] sm:$0xf0]  ;;  %v3883_v9 = vld [vmem:[%s4685_s15 + $0x1f4] sm:$0xf0] }
  0xdb   : > { %v3992_v21 = vld [vmem:[%s4685_s15 + $0x564] sm:$0xf]  ;;  %v3607_v24 = vld [vmem:[%s4685_s15 + $0x670] sm:$0xf0] }
  0xdc   : > { %v4024_v23 = vld [vmem:[%s4685_s15 + $0x664] sm:$0xf]  ;;  %v3735_v26 = vld [vmem:[%s4685_s15 + $0x770] sm:$0xf0] }
  0xdd   : > { %2223 = vmatpush.bf16.msra.mxu0 %v2810_v11  ;;  %2236 = vmatpush.bf16.msra.mxu1 %v2938_v13  ;;  %v3623_v11 = vld [vmem:[%s4685_s15 + $0x690] sm:$0xf0]  ;;  %v4060_v13 = vld [vmem:[%s4685_s15 + $0x784] sm:$0xf]  ;;  %v3610_v30 = vor.u32 %v4024_v23, %v3607_v24 }
  0xde   : > { %2249 = vmatpush.bf16.msra.mxu2 %v3066_v17  ;;  %2262 = vmatpush.bf16.msra.mxu3 %v3194_v18  ;;  %v3960_v17 = vld [vmem:[%s4685_s15 + $0x464] sm:$0xf]  ;;  %v3351_v18 = vld [vmem:[%s4685_s15 + $0x470] sm:$0xf0]  ;;  %v3626_v19 = vor.u32 %v4028_v10, %v3623_v11  ;;  %v3754_v20 = vor.u32 %v4060_v13, %v3751_v14  ;;  %v3165_v10 = vld [vmem:[%s4685_s15 + $0x2e8] sm:$0xf] }
  0xdf   : > { %v4056_v25 = vld [vmem:[%s4685_s15 + $0x764] sm:$0xf]  ;;  %v3354_v27 = vor.u32 %v3960_v17, %v3351_v18  ;;  %v3335_v12 = vld [vmem:[%s4685_s15 + $0x450] sm:$0xf0]  ;;  %v3915_v14 = vld [vmem:[%s4685_s15 + $0x2f4] sm:$0xf0] }
  0xe0   : > { %v3738_v31 = vor.u32 %v4056_v25, %v3735_v26  ;;  %v4052_v40 = vld [vmem:[%s4685_s15 + $0x744] sm:$0xf]  ;;  %v3719_v41 = vld [vmem:[%s4685_s15 + $0x750] sm:$0xf0]  ;;  %v3166_v23 = vor.u32 %v3915_v14, %v3165_v10  ;;  %v3021_v25 = vld [vmem:[%s4685_s15 + $0x1c8] sm:$0xf] }
  0xe1   : > { %2224 = vmatpush.bf16.msra.mxu0 %v2794_v28  ;;  %2237 = vmatpush.bf16.msra.mxu1 %v2922_v29  ;;  %v3482_v28 = vor.u32 %v3992_v21, %v3479_v22  ;;  %v3956_v29 = vld [vmem:[%s4685_s15 + $0x444] sm:$0xf]  ;;  %v3319_v44 = vld [vmem:[%s4685_s15 + $0x430] sm:$0xf0]  ;;  %v3722_v46 = vor.u32 %v4052_v40, %v3719_v41  ;;  %v2893_v21 = vld [vmem:[%s4685_s15 + $0xc8] sm:$0xf] }
  0xe2   : > { %2250 = vmatpush.bf16.msra.mxu2 %v3050_v32  ;;  %2263 = vmatpush.bf16.msra.mxu3 %v3178_v33  ;;  %v3988_v32 = vld [vmem:[%s4685_s15 + $0x544] sm:$0xf]  ;;  %v3463_v33 = vld [vmem:[%s4685_s15 + $0x550] sm:$0xf0]  ;;  %v3847_v22 = vld [vmem:[%s4685_s15 + $0xd4] sm:$0xf0] }
  0xe3   : > { %v3952_v43 = vld [vmem:[%s4685_s15 + $0x424] sm:$0xf]  ;;  %v3447_v50 = vld [vmem:[%s4685_s15 + $0x530] sm:$0xf0]  ;;  %v3879_v26 = vld [vmem:[%s4685_s15 + $0x1d4] sm:$0xf0] }
  0xe4   : > { %2225 = vmatmul.bf16.vlgmr.msra.gmra.mxu0 %v4838_v35  ;;  %2238 = vmatmul.bf16.vlgmr.msra.gmra.mxu1 %v4840_v36  ;;  %v3984_v49 = vld [vmem:[%s4685_s15 + $0x524] sm:$0xf]  ;;  %v3703_v56 = vld [vmem:[%s4685_s15 + $0x730] sm:$0xf0]  ;;  %v3005_v40 = vld [vmem:[%s4685_s15 + $0x1a8] sm:$0xf] }
  0xe5   : > { %2269 = vmatpush.bf16.msrb.mxu0 %v3418_v34  ;;  %2282 = vmatpush.bf16.msrb.mxu1 %v3546_v39  ;;  %v4020_v34 = vld [vmem:[%s4685_s15 + $0x644] sm:$0xf]  ;;  %v3591_v39 = vld [vmem:[%s4685_s15 + $0x650] sm:$0xf0]  ;;  %v3450_v59 = vor.u32 %v3984_v49, %v3447_v50  ;;  %v3875_v41 = vld [vmem:[%s4685_s15 + $0x1b4] sm:$0xf0] }
  0xe6   : > { %2295 = vmatpush.bf16.msrb.mxu2 %v3674_v3  ;;  %2308 = vmatpush.bf16.msrb.mxu3 %v3802_v42  ;;  %v3338_v3 = vor.u32 %v3956_v29, %v3335_v12  ;;  %v3466_v42 = vor.u32 %v3988_v32, %v3463_v33  ;;  %v3594_v45 = vor.u32 %v4020_v34, %v3591_v39  ;;  %v4048_v55 = vld [vmem:[%s4685_s15 + $0x724] sm:$0xf]  ;;  %v3303_v60 = vld [vmem:[%s4685_s15 + $0x410] sm:$0xf0]  ;;  %v3277_v29 = vld [vmem:[%s4685_s15 + $0x3c8] sm:$0xf] }
  0xe7   : > { %2251 = vmatmul.bf16.vlgmr.msra.gmra.mxu2 %v4842_v37  ;;  %2264 = vmatmul.bf16.vlgmr.msra.gmra.mxu3 %v4844_v38  ;;  %v3980_v61 = vld [vmem:[%s4685_s15 + $0x504] sm:$0xf]  ;;  %v3431_v62 = vld [vmem:[%s4685_s15 + $0x510] sm:$0xf0]  ;;  %v3706_v0 = vor.u32 %v4048_v55, %v3703_v56  ;;  %v3943_v12 = vld [vmem:[%s4685_s15 + $0x3d4] sm:$0xf0] }
  0xe8   : > { %v4044_v4 = vld [vmem:[%s4685_s15 + $0x704] sm:$0xf]  ;;  %v3687_v5 = vld [vmem:[%s4685_s15 + $0x710] sm:$0xf0]  ;;  %v3434_v13 = vor.u32 %v3980_v61, %v3431_v62  ;;  %v2877_v32 = vld [vmem:[%s4685_s15 + $0xa8] sm:$0xf]  ;;  %v3278_v39 = vor.u32 %v3943_v12, %v3277_v29 }
  0xe9   : > { %2270 = vmatpush.bf16.msrb.mxu0 %v3402_v51  ;;  %2283 = vmatpush.bf16.msrb.mxu1 %v3530_v54  ;;  %v4016_v51 = vld [vmem:[%s4685_s15 + $0x624] sm:$0xf]  ;;  %v3575_v54 = vld [vmem:[%s4685_s15 + $0x630] sm:$0xf0]  ;;  %v3690_v18 = vor.u32 %v4044_v4, %v3687_v5  ;;  %v3843_v33 = vld [vmem:[%s4685_s15 + $0xb4] sm:$0xf0] }
  0xea   : > { %2296 = vmatpush.bf16.msrb.mxu2 %v3658_v57  ;;  %2309 = vmatpush.bf16.msrb.mxu3 %v3786_v58  ;;  %v3948_v57 = vld [vmem:[%s4685_s15 + $0x404] sm:$0xf]  ;;  %v3322_v58 = vor.u32 %v3952_v43, %v3319_v44  ;;  %v3578_v63 = vor.u32 %v4016_v51, %v3575_v54  ;;  %v3261_v43 = vld [vmem:[%s4685_s15 + $0x3a8] sm:$0xf]  ;;  %v3939_v44 = vld [vmem:[%s4685_s15 + $0x3b4] sm:$0xf0] }
  0xeb   : > { %v3306_v11 = vor.u32 %v3948_v57, %v3303_v60  ;;  %v2861_v49 = vld [vmem:[%s4685_s15 + $0x88] sm:$0xf]  ;;  %v3839_v50 = vld [vmem:[%s4685_s15 + $0x94] sm:$0xf0]  ;;  %v3262_v54 = vor.u32 %v3939_v44, %v3261_v43 }
  0xec   : > { %v2989_v55 = vld [vmem:[%s4685_s15 + $0x188] sm:$0xf]  ;;  %v3871_v56 = vld [vmem:[%s4685_s15 + $0x194] sm:$0xf0]  ;;  %v2862_v61 = vor.u32 %v3839_v50, %v2861_v49 }
  0xed   : > { %2271 = vmatpush.bf16.msrb.mxu0 %v3386_v1  ;;  %2284 = vmatpush.bf16.msrb.mxu1 %v3514_v2  ;;  %v4012_v1 = vld [vmem:[%s4685_s15 + $0x604] sm:$0xf]  ;;  %v3559_v2 = vld [vmem:[%s4685_s15 + $0x610] sm:$0xf0]  ;;  %v3117_v57 = vld [vmem:[%s4685_s15 + $0x288] sm:$0xf]  ;;  %v2990_v62 = vor.u32 %v3871_v56, %v2989_v55 }
  0xee   : > { %2297 = vmatpush.bf16.msrb.mxu2 %v3642_v6  ;;  %2310 = vmatpush.bf16.msrb.mxu3 %v3770_v7  ;;  %v2909_v6 = vld [vmem:[%s4685_s15 + $0xe8] sm:$0xf]  ;;  %v3851_v7 = vld [vmem:[%s4685_s15 + $0xf4] sm:$0xf0]  ;;  %v3562_v17 = vor.u32 %v4012_v1, %v3559_v2 }
  0xef   : > { %v3935_v60 = vld [vmem:[%s4685_s15 + $0x394] sm:$0xf0]  ;;  %v2973_v4 = vld [vmem:[%s4685_s15 + $0x168] sm:$0xf] }
  0xf0   : > { %v3867_v5 = vld [vmem:[%s4685_s15 + $0x174] sm:$0xf0]  ;;  %v2941_v29 = vld [vmem:[%s4685_s15 + $0x128] sm:$0xf] }
  0xf1   : > { %2272 = vmatpush.bf16.msrb.mxu0 %v3370_v15  ;;  %2285 = vmatpush.bf16.msrb.mxu1 %v3498_v16  ;;  %v3293_v15 = vld [vmem:[%s4685_s15 + $0x3e8] sm:$0xf]  ;;  %v3947_v16 = vld [vmem:[%s4685_s15 + $0x3f4] sm:$0xf0] }
  0xf2   : > { %2298 = vmatpush.bf16.msrb.mxu2 %v3626_v19  ;;  %2311 = vmatpush.bf16.msrb.mxu3 %v3754_v20  ;;  %v2910_v19 = vor.u32 %v3851_v7, %v2909_v6  ;;  %v3038_v20 = vor.u32 %v3883_v9, %v3037_v8  ;;  %v3294_v24 = vor.u32 %v3947_v16, %v3293_v15  ;;  %v3101_v6 = vld [vmem:[%s4685_s15 + $0x268] sm:$0xf]  ;;  %v3899_v7 = vld [vmem:[%s4685_s15 + $0x274] sm:$0xf0] }
  0xf3   : > { %v3229_v8 = vld [vmem:[%s4685_s15 + $0x368] sm:$0xf]  ;;  %v3931_v9 = vld [vmem:[%s4685_s15 + $0x374] sm:$0xf0]  ;;  %v3102_v15 = vor.u32 %v3899_v7, %v3101_v6 }
  0xf4   : > { %v3831_v14 = vld [vmem:[%s4685_s15 + $0x54] sm:$0xf0]  ;;  %v3230_v16 = vor.u32 %v3931_v9, %v3229_v8  ;;  %v3181_v49 = vld [vmem:[%s4685_s15 + $0x308] sm:$0xf] }
  0xf5   : > { %2273 = vmatpush.bf16.msrb.mxu0 %v3354_v27  ;;  %2286 = vmatpush.bf16.msrb.mxu1 %v3482_v28  ;;  %v3149_v27 = vld [vmem:[%s4685_s15 + $0x2c8] sm:$0xf]  ;;  %v3911_v28 = vld [vmem:[%s4685_s15 + $0x2d4] sm:$0xf0] }
  0xf6   : > { %2299 = vmatpush.bf16.msrb.mxu2 %v3610_v30  ;;  %2312 = vmatpush.bf16.msrb.mxu3 %v3738_v31  ;;  %v2894_v30 = vor.u32 %v3847_v22, %v2893_v21  ;;  %v3022_v31 = vor.u32 %v3879_v26, %v3021_v25  ;;  %v3150_v34 = vor.u32 %v3911_v28, %v3149_v27  ;;  %v3213_v21 = vld [vmem:[%s4685_s15 + $0x348] sm:$0xf]  ;;  %v3927_v22 = vld [vmem:[%s4685_s15 + $0x354] sm:$0xf0] }
  0xf7   : > { %v2813_v25 = vld [vmem:[%s4685_s15 + $0x28] sm:$0xf]  ;;  %v3827_v26 = vld [vmem:[%s4685_s15 + $0x34] sm:$0xf0]  ;;  %v3214_v28 = vor.u32 %v3927_v22, %v3213_v21 }
  0xf8   : > { %v3859_v12 = vld [vmem:[%s4685_s15 + $0x134] sm:$0xf0]  ;;  %v3549_v55 = vld [vmem:[%s4685_s15 + $0x5e8] sm:$0xf] }
  0xf9   : > { %2274 = vmatpush.bf16.msrb.mxu0 %v3338_v3  ;;  %2287 = vmatpush.bf16.msrb.mxu1 %v3466_v42  ;;  %v3133_v3 = vld [vmem:[%s4685_s15 + $0x2a8] sm:$0xf]  ;;  %v3907_v42 = vld [vmem:[%s4685_s15 + $0x2b4] sm:$0xf0] }
  0xfa   : > { %2300 = vmatpush.bf16.msrb.mxu2 %v3594_v45  ;;  %2313 = vmatpush.bf16.msrb.mxu3 %v3722_v46  ;;  %v2878_v45 = vor.u32 %v3843_v33, %v2877_v32  ;;  %v3006_v46 = vor.u32 %v3875_v41, %v3005_v40  ;;  %v3134_v51 = vor.u32 %v3907_v42, %v3133_v3  ;;  %v3197_v32 = vld [vmem:[%s4685_s15 + $0x328] sm:$0xf]  ;;  %v3923_v33 = vld [vmem:[%s4685_s15 + $0x334] sm:$0xf0] }
  0xfb   : > { %v2942_v40 = vor.u32 %v3859_v12, %v2941_v29  ;;  %v3823_v41 = vld [vmem:[%s4685_s15 + $0x14] sm:$0xf0]  ;;  %v2925_v3 = vld [vmem:[%s4685_s15 + $0x108] sm:$0xf]  ;;  %v3198_v44 = vor.u32 %v3923_v33, %v3197_v32 }
  0xfc   : > { %v3855_v42 = vld [vmem:[%s4685_s15 + $0x114] sm:$0xf0]  ;;  %v3533_v8 = vld [vmem:[%s4685_s15 + $0x5c8] sm:$0xf] }
  0xfd   : > { %2275 = vmatpush.bf16.msrb.mxu0 %v3322_v58  ;;  %2288 = vmatpush.bf16.msrb.mxu1 %v3450_v59  ;;  %v3903_v58 = vld [vmem:[%s4685_s15 + $0x294] sm:$0xf0]  ;;  %v3245_v59 = vld [vmem:[%s4685_s15 + $0x388] sm:$0xf] }
  0xfe   : > { %2301 = vmatpush.bf16.msrb.mxu2 %v3578_v63  ;;  %2314 = vmatpush.bf16.msrb.mxu3 %v3706_v0  ;;  %v2845_v63 = vld [vmem:[%s4685_s15 + $0x68] sm:$0xf]  ;;  %v3835_v0 = vld [vmem:[%s4685_s15 + $0x74] sm:$0xf0]  ;;  %v3118_v1 = vor.u32 %v3903_v58, %v3117_v57  ;;  %v3246_v2 = vor.u32 %v3935_v60, %v3245_v59  ;;  %v2926_v59 = vor.u32 %v3855_v42, %v2925_v3 }
  0xff   : > { %v2846_v10 = vor.u32 %v3835_v0, %v2845_v63  ;;  %v3919_v50 = vld [vmem:[%s4685_s15 + $0x314] sm:$0xf0]  ;;  %v3677_v57 = vld [vmem:[%s4685_s15 + $0x6e8] sm:$0xf] }
 0x100   : > { %v4011_v56 = vld [vmem:[%s4685_s15 + $0x5f4] sm:$0xf0]  ;;  %v3182_v0 = vor.u32 %v3919_v50, %v3181_v49  ;;  %v3517_v21 = vld [vmem:[%s4685_s15 + $0x5a8] sm:$0xf] }
 0x101   : > { %2276 = vmatpush.bf16.msrb.mxu0 %v3306_v11  ;;  %2289 = vmatpush.bf16.msrb.mxu1 %v3434_v13  ;;  %v2974_v11 = vor.u32 %v3867_v5, %v2973_v4  ;;  %v2829_v13 = vld [vmem:[%s4685_s15 + $0x48] sm:$0xf]  ;;  %v4043_v60 = vld [vmem:[%s4685_s15 + $0x6f4] sm:$0xf0] }
 0x102   : > { %2302 = vmatpush.bf16.msrb.mxu2 %v3562_v17  ;;  %2315 = vmatpush.bf16.msrb.mxu3 %v3690_v18  ;;  %v2957_v17 = vld [vmem:[%s4685_s15 + $0x148] sm:$0xf]  ;;  %v3863_v18 = vld [vmem:[%s4685_s15 + $0x154] sm:$0xf0]  ;;  %v3678_v6 = vor.u32 %v4043_v60, %v3677_v57 }
 0x103   : > { %v3405_v4 = vld [vmem:[%s4685_s15 + $0x4c8] sm:$0xf]  ;;  %v3975_v5 = vld [vmem:[%s4685_s15 + $0x4d4] sm:$0xf0] }
 0x104   : > { %2277 = vmatmul.bf16.vlgmr.msrb.gmra.mxu0 %v4890_v47  ;;  %2290 = vmatmul.bf16.vlgmr.msrb.gmra.mxu1 %v4892_v48  ;;  %v4007_v9 = vld [vmem:[%s4685_s15 + $0x5d4] sm:$0xf0]  ;;  %v3373_v29 = vld [vmem:[%s4685_s15 + $0x488] sm:$0xf] }
 0x105   : > { %2321 = vmatpush.bf16.msra.mxu0 %v2910_v19  ;;  %2334 = vmatpush.bf16.msra.mxu1 %v3038_v20  ;;  %v3085_v19 = vld [vmem:[%s4685_s15 + $0x248] sm:$0xf]  ;;  %v3895_v20 = vld [vmem:[%s4685_s15 + $0x254] sm:$0xf0] }
 0x106   : > { %2347 = vmatpush.bf16.msra.mxu2 %v3166_v23  ;;  %2360 = vmatpush.bf16.msra.mxu3 %v3294_v24  ;;  %v2830_v23 = vor.u32 %v3831_v14, %v2829_v13  ;;  %v2958_v24 = vor.u32 %v3863_v18, %v2957_v17  ;;  %v3086_v27 = vor.u32 %v3895_v20, %v3085_v19  ;;  %v3789_v13 = vld [vmem:[%s4685_s15 + $0x7c8] sm:$0xf]  ;;  %v4071_v14 = vld [vmem:[%s4685_s15 + $0x7d4] sm:$0xf0] }
 0x107   : > { %2303 = vmatmul.bf16.vlgmr.msrb.gmra.mxu2 %v4896_v52  ;;  %2316 = vmatmul.bf16.vlgmr.msrb.gmra.mxu3 %v4898_v53  ;;  %v3389_v17 = vld [vmem:[%s4685_s15 + $0x4a8] sm:$0xf]  ;;  %v3971_v18 = vld [vmem:[%s4685_s15 + $0x4b4] sm:$0xf0]  ;;  %v3790_v20 = vor.u32 %v4071_v14, %v3789_v13 }
 0x108   : > { %v4003_v22 = vld [vmem:[%s4685_s15 + $0x5b4] sm:$0xf0]  ;;  %v3501_v32 = vld [vmem:[%s4685_s15 + $0x588] sm:$0xf] }
 0x109   : > { %2322 = vmatpush.bf16.msra.mxu0 %v2894_v30  ;;  %2335 = vmatpush.bf16.msra.mxu1 %v3022_v31  ;;  %v3069_v30 = vld [vmem:[%s4685_s15 + $0x228] sm:$0xf]  ;;  %v3891_v31 = vld [vmem:[%s4685_s15 + $0x234] sm:$0xf0] }
 0x10a   : > { %2348 = vmatpush.bf16.msra.mxu2 %v3150_v34  ;;  %2361 = vmatpush.bf16.msra.mxu3 %v3278_v39  ;;  %v2797_v34 = vld [vmem:[%s4685_s15 + $0x8] sm:$0xf]  ;;  %v2814_v39 = vor.u32 %v3827_v26, %v2813_v25  ;;  %v3070_v43 = vor.u32 %v3891_v31, %v3069_v30  ;;  %v4067_v26 = vld [vmem:[%s4685_s15 + $0x7b4] sm:$0xf0] }
 0x10b   : > { %v2798_v58 = vor.u32 %v3823_v41, %v2797_v34  ;;  %v3773_v25 = vld [vmem:[%s4685_s15 + $0x7a8] sm:$0xf]  ;;  %v3967_v12 = vld [vmem:[%s4685_s15 + $0x494] sm:$0xf0] }
 0x10c   : > { %v3774_v31 = vor.u32 %v4067_v26, %v3773_v25  ;;  %v3999_v33 = vld [vmem:[%s4685_s15 + $0x594] sm:$0xf0]  ;;  %v3629_v34 = vld [vmem:[%s4685_s15 + $0x688] sm:$0xf]  ;;  %v3374_v3 = vor.u32 %v3967_v12, %v3373_v29 }
 0x10d   : > { %2323 = vmatpush.bf16.msra.mxu0 %v2878_v45  ;;  %2336 = vmatpush.bf16.msra.mxu1 %v3006_v46  ;;  %v3053_v45 = vld [vmem:[%s4685_s15 + $0x208] sm:$0xf]  ;;  %v3887_v46 = vld [vmem:[%s4685_s15 + $0x214] sm:$0xf0]  ;;  %v3502_v42 = vor.u32 %v3999_v33, %v3501_v32  ;;  %v3881_v32 = vld [vmem:[%s4685_s15 + $0x1ec] sm:$0xf] }
 0x10e   : > { %2349 = vmatpush.bf16.msra.mxu2 %v3134_v51  ;;  %2362 = vmatpush.bf16.msra.mxu3 %v3262_v54  ;;  %v3421_v51 = vld [vmem:[%s4685_s15 + $0x4e8] sm:$0xf]  ;;  %v3979_v54 = vld [vmem:[%s4685_s15 + $0x4f4] sm:$0xf0]  ;;  %v3054_v63 = vor.u32 %v3887_v46, %v3053_v45  ;;  %v3039_v33 = vld [vmem:[%s4685_s15 + $0x1f8] sm:$0xf0] }
 0x10f   : > { %v4063_v41 = vld [vmem:[%s4685_s15 + $0x794] sm:$0xf0]  ;;  %v3485_v49 = vld [vmem:[%s4685_s15 + $0x568] sm:$0xf] }
 0x110   : > { %v3995_v50 = vld [vmem:[%s4685_s15 + $0x574] sm:$0xf0]  ;;  %v3453_v13 = vld [vmem:[%s4685_s15 + $0x528] sm:$0xf] }
 0x111   : > { %2324 = vmatpush.bf16.msra.mxu0 %v2862_v61  ;;  %2337 = vmatpush.bf16.msra.mxu1 %v2990_v62  ;;  %v3805_v61 = vld [vmem:[%s4685_s15 + $0x7e8] sm:$0xf]  ;;  %v4075_v62 = vld [vmem:[%s4685_s15 + $0x7f4] sm:$0xf0] }
 0x112   : > { %2350 = vmatpush.bf16.msra.mxu2 %v3118_v1  ;;  %2363 = vmatpush.bf16.msra.mxu3 %v3246_v2  ;;  %v3422_v1 = vor.u32 %v3979_v54, %v3421_v51  ;;  %v3550_v2 = vor.u32 %v4011_v56, %v3549_v55  ;;  %v3806_v7 = vor.u32 %v4075_v62, %v3805_v61  ;;  %v3613_v51 = vld [vmem:[%s4685_s15 + $0x668] sm:$0xf]  ;;  %v4027_v54 = vld [vmem:[%s4685_s15 + $0x674] sm:$0xf0] }
 0x113   : > { %v3741_v55 = vld [vmem:[%s4685_s15 + $0x768] sm:$0xf]  ;;  %v4059_v56 = vld [vmem:[%s4685_s15 + $0x774] sm:$0xf0]  ;;  %v3614_v61 = vor.u32 %v4027_v54, %v3613_v51 }
 0x114   : > { %v3959_v60 = vld [vmem:[%s4685_s15 + $0x454] sm:$0xf0]  ;;  %v3742_v62 = vor.u32 %v4059_v56, %v3741_v55  ;;  %v3693_v29 = vld [vmem:[%s4685_s15 + $0x708] sm:$0xf]  ;;  %v3877_v55 = vld [vmem:[%s4685_s15 + $0x1cc] sm:$0xf] }
 0x115   : > { %2325 = vmatpush.bf16.msra.mxu0 %v2846_v10  ;;  %2338 = vmatpush.bf16.msra.mxu1 %v2974_v11  ;;  %v3661_v10 = vld [vmem:[%s4685_s15 + $0x6c8] sm:$0xf]  ;;  %v4039_v11 = vld [vmem:[%s4685_s15 + $0x6d4] sm:$0xf0]  ;;  %v3023_v56 = vld [vmem:[%s4685_s15 + $0x1d8] sm:$0xf0] }
 0x116   : > { %2351 = vmatpush.bf16.msra.mxu2 %v3102_v15  ;;  %2364 = vmatpush.bf16.msra.mxu3 %v3230_v16  ;;  %v3406_v15 = vor.u32 %v3975_v5, %v3405_v4  ;;  %v3534_v16 = vor.u32 %v4007_v9, %v3533_v8  ;;  %v3662_v19 = vor.u32 %v4039_v11, %v3661_v10  ;;  %v3725_v4 = vld [vmem:[%s4685_s15 + $0x748] sm:$0xf]  ;;  %v4055_v5 = vld [vmem:[%s4685_s15 + $0x754] sm:$0xf0] }
 0x117   : > { %v3325_v8 = vld [vmem:[%s4685_s15 + $0x428] sm:$0xf]  ;;  %v3955_v9 = vld [vmem:[%s4685_s15 + $0x434] sm:$0xf0]  ;;  %v3726_v11 = vor.u32 %v4055_v5, %v3725_v4  ;;  %v3873_v4 = vld [vmem:[%s4685_s15 + $0x1ac] sm:$0xf] }
 0x118   : > { %v3987_v14 = vld [vmem:[%s4685_s15 + $0x534] sm:$0xf0]  ;;  %v3007_v5 = vld [vmem:[%s4685_s15 + $0x1b8] sm:$0xf0] }
 0x119   : > { %2326 = vmatpush.bf16.msra.mxu0 %v2830_v23  ;;  %2339 = vmatpush.bf16.msra.mxu1 %v2958_v24  ;;  %v3645_v23 = vld [vmem:[%s4685_s15 + $0x6a8] sm:$0xf]  ;;  %v4035_v24 = vld [vmem:[%s4685_s15 + $0x6b4] sm:$0xf0] }
 0x11a   : > { %2352 = vmatpush.bf16.msra.mxu2 %v3086_v27  ;;  %2365 = vmatpush.bf16.msra.mxu3 %v3214_v28  ;;  %v3390_v27 = vor.u32 %v3971_v18, %v3389_v17  ;;  %v3518_v28 = vor.u32 %v4003_v22, %v3517_v21  ;;  %v3646_v30 = vor.u32 %v4035_v24, %v3645_v23  ;;  %v3709_v17 = vld [vmem:[%s4685_s15 + $0x728] sm:$0xf]  ;;  %v4051_v18 = vld [vmem:[%s4685_s15 + $0x734] sm:$0xf0] }
 0x11b   : > { %v3454_v21 = vor.u32 %v3987_v14, %v3453_v13  ;;  %v3951_v22 = vld [vmem:[%s4685_s15 + $0x414] sm:$0xf0]  ;;  %v3437_v23 = vld [vmem:[%s4685_s15 + $0x508] sm:$0xf]  ;;  %v3710_v26 = vor.u32 %v4051_v18, %v3709_v17  ;;  %v3010_v14 = vor.u32 %v3873_v4, %v3007_v5  ;;  %v3857_v4 = vld [vmem:[%s4685_s15 + $0x12c] sm:$0xf] }
 0x11c   : > { %v3983_v24 = vld [vmem:[%s4685_s15 + $0x514] sm:$0xf0]  ;;  %v2943_v5 = vld [vmem:[%s4685_s15 + $0x138] sm:$0xf0] }
 0x11d   : > { %2327 = vmatpush.bf16.msra.mxu0 %v2814_v39  ;;  %2340 = vmatpush.bf16.msra.mxu1 %v2942_v40  ;;  %v4031_v39 = vld [vmem:[%s4685_s15 + $0x694] sm:$0xf0]  ;;  %v3757_v40 = vld [vmem:[%s4685_s15 + $0x788] sm:$0xf] }
 0x11e   : > { %2353 = vmatpush.bf16.msra.mxu2 %v3070_v43  ;;  %2366 = vmatpush.bf16.msra.mxu3 %v3198_v44  ;;  %v3357_v43 = vld [vmem:[%s4685_s15 + $0x468] sm:$0xf]  ;;  %v3963_v44 = vld [vmem:[%s4685_s15 + $0x474] sm:$0xf0]  ;;  %v3630_v45 = vor.u32 %v4031_v39, %v3629_v34  ;;  %v3758_v46 = vor.u32 %v4063_v41, %v3757_v40  ;;  %v3913_v34 = vld [vmem:[%s4685_s15 + $0x2ec] sm:$0xf]  ;;  %v3438_v40 = vor.u32 %v3983_v24, %v3437_v23 }
 0x11f   : > { %v3358_v57 = vor.u32 %v3963_v44, %v3357_v43  ;;  %v4047_v12 = vld [vmem:[%s4685_s15 + $0x714] sm:$0xf0]  ;;  %v3167_v41 = vld [vmem:[%s4685_s15 + $0x2f8] sm:$0xf0]  ;;  %v3933_v23 = vld [vmem:[%s4685_s15 + $0x38c] sm:$0xf] }
 0x120   : > { %v3694_v44 = vor.u32 %v4047_v12, %v3693_v29  ;;  %v3170_v51 = vor.u32 %v3913_v34, %v3167_v41  ;;  %v3247_v24 = vld [vmem:[%s4685_s15 + $0x398] sm:$0xf0] }
 0x121   : > { %2328 = vmatpush.bf16.msra.mxu0 %v2798_v58  ;;  %2341 = vmatpush.bf16.msra.mxu1 %v2926_v59  ;;  %v3486_v58 = vor.u32 %v3995_v50, %v3485_v49  ;;  %v3341_v59 = vld [vmem:[%s4685_s15 + $0x448] sm:$0xf]  ;;  %v3845_v49 = vld [vmem:[%s4685_s15 + $0xcc] sm:$0xf]  ;;  %v2895_v50 = vld [vmem:[%s4685_s15 + $0xd8] sm:$0xf0]  ;;  %v3250_v12 = vor.u32 %v3933_v23, %v3247_v24 }
 0x122   : > { %2354 = vmatpush.bf16.msra.mxu2 %v3054_v63  ;;  %2367 = vmatpush.bf16.msra.mxu3 %v3182_v0  ;;  %v3469_v63 = vld [vmem:[%s4685_s15 + $0x548] sm:$0xf]  ;;  %v3991_v0 = vld [vmem:[%s4685_s15 + $0x554] sm:$0xf0]  ;;  %v3231_v41 = vld [vmem:[%s4685_s15 + $0x378] sm:$0xf0] }
 0x124   : > { %2329 = vmatmul.bf16.vlgmr.msra.gmra.mxu0 %v4838_v35  ;;  %2342 = vmatmul.bf16.vlgmr.msra.gmra.mxu1 %v4840_v36 }
 0x125   : > { %2373 = vmatpush.bf16.msrb.mxu0 %v3422_v1  ;;  %2386 = vmatpush.bf16.msrb.mxu1 %v3550_v2  ;;  %v3597_v1 = vld [vmem:[%s4685_s15 + $0x648] sm:$0xf]  ;;  %v4023_v2 = vld [vmem:[%s4685_s15 + $0x654] sm:$0xf0] }
 0x126   : > { %2399 = vmatpush.bf16.msrb.mxu2 %v3678_v6  ;;  %2412 = vmatpush.bf16.msrb.mxu3 %v3806_v7  ;;  %v3342_v6 = vor.u32 %v3959_v60, %v3341_v59  ;;  %v3470_v7 = vor.u32 %v3991_v0, %v3469_v63  ;;  %v3598_v10 = vor.u32 %v4023_v2, %v3597_v1  ;;  %v3941_v59 = vld [vmem:[%s4685_s15 + $0x3cc] sm:$0xf]  ;;  %v3279_v60 = vld [vmem:[%s4685_s15 + $0x3d8] sm:$0xf0] }
 0x127   : > { %2355 = vmatmul.bf16.vlgmr.msra.gmra.mxu2 %v4842_v37  ;;  %2368 = vmatmul.bf16.vlgmr.msra.gmra.mxu3 %v4844_v38  ;;  %v3841_v63 = vld [vmem:[%s4685_s15 + $0xac] sm:$0xf]  ;;  %v2879_v0 = vld [vmem:[%s4685_s15 + $0xb8] sm:$0xf0]  ;;  %v3282_v2 = vor.u32 %v3941_v59, %v3279_v60 }
 0x128   : > { %v2882_v13 = vor.u32 %v3841_v63, %v2879_v0  ;;  %v3215_v59 = vld [vmem:[%s4685_s15 + $0x358] sm:$0xf0]  ;;  %v3825_v63 = vld [vmem:[%s4685_s15 + $0x2c] sm:$0xf] }
 0x129   : > { %2374 = vmatpush.bf16.msrb.mxu0 %v3406_v15  ;;  %2387 = vmatpush.bf16.msrb.mxu1 %v3534_v16  ;;  %v3581_v15 = vld [vmem:[%s4685_s15 + $0x628] sm:$0xf]  ;;  %v4019_v16 = vld [vmem:[%s4685_s15 + $0x634] sm:$0xf0]  ;;  %v2815_v0 = vld [vmem:[%s4685_s15 + $0x38] sm:$0xf0] }
 0x12a   : > { %2400 = vmatpush.bf16.msrb.mxu2 %v3662_v19  ;;  %2413 = vmatpush.bf16.msrb.mxu3 %v3790_v20  ;;  %v3309_v19 = vld [vmem:[%s4685_s15 + $0x408] sm:$0xf]  ;;  %v3326_v20 = vor.u32 %v3955_v9, %v3325_v8  ;;  %v3582_v25 = vor.u32 %v4019_v16, %v3581_v15  ;;  %v3937_v8 = vld [vmem:[%s4685_s15 + $0x3ac] sm:$0xf]  ;;  %v3263_v9 = vld [vmem:[%s4685_s15 + $0x3b8] sm:$0xf0] }
 0x12b   : > { %v3310_v39 = vor.u32 %v3951_v22, %v3309_v19  ;;  %v3837_v15 = vld [vmem:[%s4685_s15 + $0x8c] sm:$0xf]  ;;  %v2863_v16 = vld [vmem:[%s4685_s15 + $0x98] sm:$0xf0]  ;;  %v3266_v18 = vor.u32 %v3937_v8, %v3263_v9 }
 0x12c   : > { %v3869_v19 = vld [vmem:[%s4685_s15 + $0x18c] sm:$0xf]  ;;  %v3119_v22 = vld [vmem:[%s4685_s15 + $0x298] sm:$0xf0] }
 0x12d   : > { %2375 = vmatpush.bf16.msrb.mxu0 %v3390_v27  ;;  %2388 = vmatpush.bf16.msrb.mxu1 %v3518_v28  ;;  %v3565_v27 = vld [vmem:[%s4685_s15 + $0x608] sm:$0xf]  ;;  %v4015_v28 = vld [vmem:[%s4685_s15 + $0x614] sm:$0xf0]  ;;  %v3071_v9 = vld [vmem:[%s4685_s15 + $0x238] sm:$0xf0] }
 0x12e   : > { %2401 = vmatpush.bf16.msrb.mxu2 %v3646_v30  ;;  %2414 = vmatpush.bf16.msrb.mxu3 %v3774_v31  ;;  %v3849_v30 = vld [vmem:[%s4685_s15 + $0xec] sm:$0xf]  ;;  %v2911_v31 = vld [vmem:[%s4685_s15 + $0xf8] sm:$0xf0]  ;;  %v3566_v43 = vor.u32 %v4015_v28, %v3565_v27 }
 0x12f   : > { %v3833_v27 = vld [vmem:[%s4685_s15 + $0x6c] sm:$0xf]  ;;  %v2847_v28 = vld [vmem:[%s4685_s15 + $0x78] sm:$0xf0] }
 0x131   : > { %2376 = vmatpush.bf16.msrb.mxu0 %v3374_v3  ;;  %2389 = vmatpush.bf16.msrb.mxu1 %v3502_v42  ;;  %v3945_v3 = vld [vmem:[%s4685_s15 + $0x3ec] sm:$0xf]  ;;  %v3295_v42 = vld [vmem:[%s4685_s15 + $0x3f8] sm:$0xf0] }
 0x132   : > { %2402 = vmatpush.bf16.msrb.mxu2 %v3630_v45  ;;  %2415 = vmatpush.bf16.msrb.mxu3 %v3758_v46  ;;  %v2914_v45 = vor.u32 %v3849_v30, %v2911_v31  ;;  %v3042_v46 = vor.u32 %v3881_v32, %v3039_v33  ;;  %v3298_v54 = vor.u32 %v3945_v3, %v3295_v42  ;;  %v3865_v30 = vld [vmem:[%s4685_s15 + $0x16c] sm:$0xf]  ;;  %v2975_v31 = vld [vmem:[%s4685_s15 + $0x178] sm:$0xf0] }
 0x133   : > { %v3897_v32 = vld [vmem:[%s4685_s15 + $0x26c] sm:$0xf] }
 0x135   : > { %2377 = vmatpush.bf16.msrb.mxu0 %v3358_v57  ;;  %2390 = vmatpush.bf16.msrb.mxu1 %v3486_v58  ;;  %v3909_v57 = vld [vmem:[%s4685_s15 + $0x2cc] sm:$0xf]  ;;  %v3151_v58 = vld [vmem:[%s4685_s15 + $0x2d8] sm:$0xf0] }
 0x136   : > { %2403 = vmatpush.bf16.msrb.mxu2 %v3614_v61  ;;  %2416 = vmatpush.bf16.msrb.mxu3 %v3742_v62  ;;  %v2898_v61 = vor.u32 %v3845_v49, %v2895_v50  ;;  %v3026_v62 = vor.u32 %v3877_v55, %v3023_v56  ;;  %v3154_v1 = vor.u32 %v3909_v57, %v3151_v58  ;;  %v2959_v55 = vld [vmem:[%s4685_s15 + $0x158] sm:$0xf0]  ;;  %v3893_v56 = vld [vmem:[%s4685_s15 + $0x24c] sm:$0xf] }
 0x137   : > { %v3087_v57 = vld [vmem:[%s4685_s15 + $0x258] sm:$0xf0]  ;;  %v3925_v58 = vld [vmem:[%s4685_s15 + $0x34c] sm:$0xf] }
 0x139   : > { %2378 = vmatpush.bf16.msrb.mxu0 %v3342_v6  ;;  %2391 = vmatpush.bf16.msrb.mxu1 %v3470_v7  ;;  %v3905_v6 = vld [vmem:[%s4685_s15 + $0x2ac] sm:$0xf]  ;;  %v3135_v7 = vld [vmem:[%s4685_s15 + $0x2b8] sm:$0xf0] }
 0x13a   : > { %2404 = vmatpush.bf16.msrb.mxu2 %v3598_v10  ;;  %2417 = vmatpush.bf16.msrb.mxu3 %v3726_v11  ;;  %v3138_v17 = vor.u32 %v3905_v6, %v3135_v7  ;;  %v3889_v6 = vld [vmem:[%s4685_s15 + $0x22c] sm:$0xf] }
 0x13d   : > { %2379 = vmatpush.bf16.msrb.mxu0 %v3326_v20  ;;  %2392 = vmatpush.bf16.msrb.mxu1 %v3454_v21  ;;  %v2991_v20 = vld [vmem:[%s4685_s15 + $0x198] sm:$0xf0]  ;;  %v3901_v21 = vld [vmem:[%s4685_s15 + $0x28c] sm:$0xf] }
 0x13e   : > { %2405 = vmatpush.bf16.msrb.mxu2 %v3582_v25  ;;  %2418 = vmatpush.bf16.msrb.mxu3 %v3710_v26  ;;  %v2866_v25 = vor.u32 %v3837_v15, %v2863_v16  ;;  %v2994_v26 = vor.u32 %v3869_v19, %v2991_v20  ;;  %v3122_v29 = vor.u32 %v3901_v21, %v3119_v22  ;;  %v3821_v16 = vld [vmem:[%s4685_s15 + $0xc] sm:$0xf]  ;;  %v2799_v19 = vld [vmem:[%s4685_s15 + $0x18] sm:$0xf0] }
 0x13f   : > { %v3853_v20 = vld [vmem:[%s4685_s15 + $0x10c] sm:$0xf]  ;;  %v2927_v21 = vld [vmem:[%s4685_s15 + $0x118] sm:$0xf0]  ;;  %v3074_v22 = vor.u32 %v3889_v6, %v3071_v9 }
 0x140   : > { %v2122_v10 = vpop.f32.mrf.mxu0  ;;  %v2135_v11 = vpop.f32.mrf.mxu1  ;;  %v3391_v6 = vld [vmem:[%s4685_s15 + $0x4b8] sm:$0xf0] }
 0x141   : > { %2380 = vmatpush.bf16.msrb.mxu0 %v3310_v39  ;;  %2393 = vmatpush.bf16.msrb.mxu1 %v3438_v40  ;;  %v3103_v39 = vld [vmem:[%s4685_s15 + $0x278] sm:$0xf0]  ;;  %v3929_v40 = vld [vmem:[%s4685_s15 + $0x36c] sm:$0xf]  ;;  %v2136_v49 = vadd.f32 %v2135_v11, %v2122_v10 }
 0x142   : > { %2406 = vmatpush.bf16.msrb.mxu2 %v3566_v43  ;;  %2419 = vmatpush.bf16.msrb.mxu3 %v3694_v44  ;;  %v2850_v43 = vor.u32 %v3833_v27, %v2847_v28  ;;  %v2978_v44 = vor.u32 %v3865_v30, %v2975_v31  ;;  %v3106_v50 = vor.u32 %v3897_v32, %v3103_v39  ;;  %v3921_v10 = vld [vmem:[%s4685_s15 + $0x32c] sm:$0xf]  ;;  %v3199_v11 = vld [vmem:[%s4685_s15 + $0x338] sm:$0xf0] }
 0x143   : > { %v3202_v23 = vor.u32 %v3921_v10, %v3199_v11  ;;  %v3917_v27 = vld [vmem:[%s4685_s15 + $0x30c] sm:$0xf]  ;;  %v3183_v28 = vld [vmem:[%s4685_s15 + $0x318] sm:$0xf0] }
 0x144   : > { %2381 = vmatmul.bf16.vlgmr.msrb.gmra.mxu0 %v4890_v47  ;;  %2394 = vmatmul.bf16.vlgmr.msrb.gmra.mxu1 %v4892_v48  ;;  %v4009_v30 = vld [vmem:[%s4685_s15 + $0x5ec] sm:$0xf]  ;;  %v3551_v31 = vld [vmem:[%s4685_s15 + $0x5f8] sm:$0xf0] }
 0x145   : > { %2425 = vmatpush.bf16.msra.mxu0 %v2914_v45  ;;  %2438 = vmatpush.bf16.msra.mxu1 %v3042_v46  ;;  %v3829_v45 = vld [vmem:[%s4685_s15 + $0x4c] sm:$0xf]  ;;  %v2831_v46 = vld [vmem:[%s4685_s15 + $0x58] sm:$0xf0] }
 0x146   : > { %2451 = vmatpush.bf16.msra.mxu2 %v3170_v51  ;;  %2464 = vmatpush.bf16.msra.mxu3 %v3298_v54  ;;  %v3234_v51 = vor.u32 %v3929_v40, %v3231_v41  ;;  %v3861_v54 = vld [vmem:[%s4685_s15 + $0x14c] sm:$0xf]  ;;  %v3679_v39 = vld [vmem:[%s4685_s15 + $0x6f8] sm:$0xf0] }
 0x147   : > { %2407 = vmatmul.bf16.vlgmr.msrb.gmra.mxu2 %v4896_v52  ;;  %2420 = vmatmul.bf16.vlgmr.msrb.gmra.mxu3 %v4898_v53  ;;  %v2148_v33 = vpop.f32.mrf.mxu2  ;;  %v2161_v34 = vpop.f32.mrf.mxu3  ;;  %v4041_v32 = vld [vmem:[%s4685_s15 + $0x6ec] sm:$0xf]  ;;  %v3807_v41 = vld [vmem:[%s4685_s15 + $0x7f8] sm:$0xf0] }
 0x148   : > { %v2124_v3 = vpop.f32.mrf.mxu0  ;;  %v2137_v42 = vpop.f32.mrf.mxu1  ;;  %v2149_v60 = vadd.f32 %v2148_v33, %v2136_v49  ;;  %v2802_v33 = vor.u32 %v3821_v16, %v2799_v19  ;;  %v4073_v40 = vld [vmem:[%s4685_s15 + $0x7ec] sm:$0xf]  ;;  %v3519_v11 = vld [vmem:[%s4685_s15 + $0x5b8] sm:$0xf0] }
 0x149   : > { %2426 = vmatpush.bf16.msra.mxu0 %v2898_v61  ;;  %2439 = vmatpush.bf16.msra.mxu1 %v3026_v62  ;;  %v2834_v61 = vor.u32 %v3829_v45, %v2831_v46  ;;  %v2962_v62 = vor.u32 %v3861_v54, %v2959_v55  ;;  %v3554_v45 = vor.u32 %v4009_v30, %v3551_v31  ;;  %v3775_v16 = vld [vmem:[%s4685_s15 + $0x7b8] sm:$0xf0] }
 0x14a   : > { %2452 = vmatpush.bf16.msra.mxu2 %v3154_v1  ;;  %2465 = vmatpush.bf16.msra.mxu3 %v3282_v2  ;;  %v3090_v1 = vor.u32 %v3893_v56, %v3087_v57  ;;  %v3218_v2 = vor.u32 %v3925_v58, %v3215_v59  ;;  %v3682_v54 = vor.u32 %v4041_v32, %v3679_v39  ;;  %v4005_v59 = vld [vmem:[%s4685_s15 + $0x5cc] sm:$0xf] }
 0x14b   : > { %v3810_v55 = vor.u32 %v4073_v40, %v3807_v41  ;;  %v3993_v41 = vld [vmem:[%s4685_s15 + $0x56c] sm:$0xf] }
 0x14d   : > { %2427 = vmatpush.bf16.msra.mxu0 %v2882_v13  ;;  %2440 = vmatpush.bf16.msra.mxu1 %v3010_v14  ;;  %v2162_v13 = vadd.f32 %v2161_v34, %v2149_v60  ;;  %v2930_v34 = vor.u32 %v3853_v20, %v2927_v21  ;;  %v3535_v60 = vld [vmem:[%s4685_s15 + $0x5d8] sm:$0xf0]  ;;  %v3965_v21 = vld [vmem:[%s4685_s15 + $0x48c] sm:$0xf] }
 0x14e   : > { %2453 = vmatpush.bf16.msra.mxu2 %v3138_v17  ;;  %2466 = vmatpush.bf16.msra.mxu3 %v3266_v18  ;;  %v2818_v17 = vor.u32 %v3825_v63, %v2815_v0  ;;  %v2946_v18 = vor.u32 %v3857_v4, %v2943_v5  ;;  %v4069_v63 = vld [vmem:[%s4685_s15 + $0x7cc] sm:$0xf]  ;;  %v3791_v0 = vld [vmem:[%s4685_s15 + $0x7d8] sm:$0xf0]  ;;  %v3538_v5 = vor.u32 %v4005_v59, %v3535_v60 }
 0x14f   : > { %v2150_v7 = vpop.f32.mrf.mxu2  ;;  %v2163_v8 = vpop.f32.mrf.mxu3  ;;  %v3794_v10 = vor.u32 %v4069_v63, %v3791_v0  ;;  %v3471_v59 = vld [vmem:[%s4685_s15 + $0x558] sm:$0xf0]  ;;  %v4021_v60 = vld [vmem:[%s4685_s15 + $0x64c] sm:$0xf] }
 0x150   : > { %v2174_v14 = vpop.f32.mrf.mxu0  ;;  %v2187_v15 = vpop.f32.mrf.mxu1  ;;  %v4001_v7 = vld [vmem:[%s4685_s15 + $0x5ac] sm:$0xf]  ;;  %v2544_v8 = vld [vmem:[%s4675_s27] sm:$0xff]  ;;  %v3599_v63 = vld [vmem:[%s4685_s15 + $0x658] sm:$0xf0] }
 0x151   : > { %2428 = vmatpush.bf16.msra.mxu0 %v2866_v25  ;;  %2441 = vmatpush.bf16.msra.mxu1 %v2994_v26  ;;  %v2175_v24 = vadd.f32 %v2174_v14, %v2162_v13  ;;  %v3885_v25 = vld [vmem:[%s4685_s15 + $0x20c] sm:$0xf]  ;;  %v3055_v26 = vld [vmem:[%s4685_s15 + $0x218] sm:$0xf0] }
 0x152   : > { %2454 = vmatpush.bf16.msra.mxu2 %v3122_v29  ;;  %2467 = vmatpush.bf16.msra.mxu3 %v3250_v12  ;;  %v3977_v29 = vld [vmem:[%s4685_s15 + $0x4ec] sm:$0xf]  ;;  %v3423_v12 = vld [vmem:[%s4685_s15 + $0x4f8] sm:$0xf0]  ;;  %v3058_v42 = vor.u32 %v3885_v25, %v3055_v26 }
 0x153   : > { %v2188_v3 = vadd.f32 %v2187_v15, %v2175_v24  ;;  %v4033_v13 = vld [vmem:[%s4685_s15 + $0x6ac] sm:$0xf]  ;;  %v3647_v14 = vld [vmem:[%s4685_s15 + $0x6b8] sm:$0xf0] }
 0x154   : > { %v4065_v15 = vld [vmem:[%s4685_s15 + $0x7ac] sm:$0xf]  ;;  %v3503_v24 = vld [vmem:[%s4685_s15 + $0x598] sm:$0xf0] }
 0x155   : > { %2429 = vmatpush.bf16.msra.mxu0 %v2850_v43  ;;  %2442 = vmatpush.bf16.msra.mxu1 %v2978_v44  ;;  %v3186_v43 = vor.u32 %v3917_v27, %v3183_v28  ;;  %v3426_v44 = vor.u32 %v3977_v29, %v3423_v12  ;;  %v4029_v25 = vld [vmem:[%s4685_s15 + $0x68c] sm:$0xf]  ;;  %v3631_v27 = vld [vmem:[%s4685_s15 + $0x698] sm:$0xf0] }
 0x156   : > { %2455 = vmatpush.bf16.msra.mxu2 %v3106_v50  ;;  %2468 = vmatpush.bf16.msra.mxu3 %v3234_v51  ;;  %v3973_v50 = vld [vmem:[%s4685_s15 + $0x4cc] sm:$0xf]  ;;  %v3407_v51 = vld [vmem:[%s4685_s15 + $0x4d8] sm:$0xf0]  ;;  %v3634_v39 = vor.u32 %v4029_v25, %v3631_v27 }
 0x157   : > { %v2200_v46 = vpop.f32.mrf.mxu2  ;;  %v2213_v49 = vpop.f32.mrf.mxu3  ;;  %v3410_v4 = vor.u32 %v3973_v50, %v3407_v51  ;;  %v4061_v28 = vld [vmem:[%s4685_s15 + $0x78c] sm:$0xf]  ;;  %v3759_v29 = vld [vmem:[%s4685_s15 + $0x798] sm:$0xf0] }
 0x158   : > { %v2201_v56 = vadd.f32 %v2200_v46, %v2188_v3  ;;  %v2176_v57 = vpop.f32.mrf.mxu0  ;;  %v2189_v58 = vpop.f32.mrf.mxu1  ;;  %v3762_v40 = vor.u32 %v4061_v28, %v3759_v29  ;;  %v3487_v3 = vld [vmem:[%s4685_s15 + $0x578] sm:$0xf0]  ;;  %v2564_v46 = vld [vmem:[%s5252_s22] sm:$0xff]  ;;  %v3957_v51 = vld [vmem:[%s4685_s15 + $0x44c] sm:$0xf] }
 0x159   : > { %2430 = vmatpush.bf16.msra.mxu0 %v2834_v61  ;;  %2443 = vmatpush.bf16.msra.mxu1 %v2962_v62  ;;  %v4037_v61 = vld [vmem:[%s4685_s15 + $0x6cc] sm:$0xf]  ;;  %v3663_v62 = vld [vmem:[%s4685_s15 + $0x6d8] sm:$0xf0]  ;;  %v3490_v50 = vor.u32 %v3993_v41, %v3487_v3 }
 0x15a   : > { %2456 = vmatpush.bf16.msra.mxu2 %v3090_v1  ;;  %2469 = vmatpush.bf16.msra.mxu3 %v3218_v2  ;;  %v2214_v1 = vadd.f32 %v2213_v49, %v2201_v56  ;;  %v3969_v2 = vld [vmem:[%s4685_s15 + $0x4ac] sm:$0xf]  ;;  %v3666_v9 = vor.u32 %v4037_v61, %v3663_v62  ;;  %v3567_v27 = vld [vmem:[%s4685_s15 + $0x618] sm:$0xf0] }
 0x15b   : > { %v3989_v58 = vld [vmem:[%s4685_s15 + $0x54c] sm:$0xf]  ;;  %v3695_v29 = vld [vmem:[%s4685_s15 + $0x718] sm:$0xf0] }
 0x15c   : > { %v4053_v0 = vld [vmem:[%s4685_s15 + $0x74c] sm:$0xf] }
 0x15d   : > { %2431 = vmatpush.bf16.msra.mxu0 %v2818_v17  ;;  %2444 = vmatpush.bf16.msra.mxu1 %v2946_v18  ;;  %v2552_v17 = vld [vmem:[%s5226_s25] sm:$0xff]  ;;  %v2548_v18 = vadd.f32 %v2544_v8, %v2214_v1  ;;  %v3727_v1 = vld [vmem:[%s4685_s15 + $0x758] sm:$0xf0]  ;;  %v3953_v8 = vld [vmem:[%s4685_s15 + $0x42c] sm:$0xf] }
 0x15e   : > { %2457 = vmatpush.bf16.msra.mxu2 %v3074_v22  ;;  %2470 = vmatpush.bf16.msra.mxu3 %v3202_v23  ;;  %v3375_v22 = vld [vmem:[%s4685_s15 + $0x498] sm:$0xf0]  ;;  %v3650_v23 = vor.u32 %v4033_v13, %v3647_v14  ;;  %v3730_v13 = vor.u32 %v4053_v0, %v3727_v1  ;;  %v3985_v14 = vld [vmem:[%s4685_s15 + $0x52c] sm:$0xf] }
 0x15f   : > { %v2202_v19 = vpop.f32.mrf.mxu2  ;;  %v2215_v20 = vpop.f32.mrf.mxu3  ;;  %v2556_v26 = vadd.f32 %v2552_v17, %v2548_v18  ;;  %v3378_v31 = vor.u32 %v3965_v21, %v3375_v22  ;;  %v3583_v17 = vld [vmem:[%s4685_s15 + $0x638] sm:$0xf0]  ;;  %v4049_v18 = vld [vmem:[%s4685_s15 + $0x72c] sm:$0xf] }
 0x160   : > { %v3949_v20 = vld [vmem:[%s4685_s15 + $0x40c] sm:$0xf]  ;;  %v3311_v21 = vld [vmem:[%s4685_s15 + $0x418] sm:$0xf0] }
 0x161   : > { %2432 = vmatpush.bf16.msra.mxu0 %v2802_v33  ;;  %2445 = vmatpush.bf16.msra.mxu1 %v2930_v34  ;;  %v5239_v12 = vpop.f32.mrf.mxu0  ;;  %v5241_v30 = vpop.f32.mrf.mxu1  ;;  %4181 = vtanh.f32 %v2556_v26  ;;  %v3961_v33 = vld [vmem:[%s4685_s15 + $0x46c] sm:$0xf]  ;;  %v3359_v34 = vld [vmem:[%s4685_s15 + $0x478] sm:$0xf0] }
 0x162   : > { %2458 = vmatpush.bf16.msra.mxu2 %v3058_v42  ;;  %2471 = vmatpush.bf16.msra.mxu3 %v3186_v43  ;;  %v4025_v42 = vld [vmem:[%s4685_s15 + $0x66c] sm:$0xf]  ;;  %v3615_v43 = vld [vmem:[%s4685_s15 + $0x678] sm:$0xf0]  ;;  %v3362_v49 = vor.u32 %v3961_v33, %v3359_v34 }
 0x163   : > { %v3618_v56 = vor.u32 %v4025_v42, %v3615_v43  ;;  %v4045_v28 = vld [vmem:[%s4685_s15 + $0x70c] sm:$0xf] }
 0x164   : > { %2433 = vmatmul.bf16.vlgmr.msra.gmra.mxu0 %v4838_v35  ;;  %2446 = vmatmul.bf16.vlgmr.msra.gmra.mxu1 %v4840_v36  ;;  %v3394_v35 = vor.u32 %v3969_v2, %v3391_v6  ;;  %v3522_v36 = vor.u32 %v4001_v7, %v3519_v11  ;;  %v3474_v7 = vor.u32 %v3989_v58, %v3471_v59 }
 0x165   : > { %2477 = vmatpush.bf16.msrb.mxu0 %v3426_v44  ;;  %2490 = vmatpush.bf16.msrb.mxu1 %v3554_v45  ;;  %v4057_v44 = vld [vmem:[%s4685_s15 + $0x76c] sm:$0xf]  ;;  %v3743_v45 = vld [vmem:[%s4685_s15 + $0x778] sm:$0xf0]  ;;  %v3602_v11 = vor.u32 %v4021_v60, %v3599_v63  ;;  %v3698_v34 = vor.u32 %v4045_v28, %v3695_v29 }
 0x166   : > { %2503 = vmatpush.bf16.msrb.mxu2 %v3682_v54  ;;  %2516 = vmatpush.bf16.msrb.mxu3 %v3810_v55  ;;  %v3343_v54 = vld [vmem:[%s4685_s15 + $0x458] sm:$0xf0]  ;;  %v3746_v57 = vor.u32 %v4057_v44, %v3743_v45 }
 0x167   : > { %2459 = vmatmul.bf16.vlgmr.msra.gmra.mxu2 %v4842_v37  ;;  %2472 = vmatmul.bf16.vlgmr.msra.gmra.mxu3 %v4844_v38  ;;  %v3778_v37 = vor.u32 %v4065_v15, %v3775_v16  ;;  %v3997_v38 = vld [vmem:[%s4685_s15 + $0x58c] sm:$0xf]  ;;  %v4182_v55 = vpop.eup %4181  ;;  %v3346_v6 = vor.u32 %v3957_v51, %v3343_v54  ;;  %v3455_v15 = vld [vmem:[%s4685_s15 + $0x538] sm:$0xf0] }
 0x168   : > { %v3506_v32 = vor.u32 %v3997_v38, %v3503_v24  ;;  %v2568_v2 = vsub.f32 %v4182_v55, %v2564_v46  ;;  %v4017_v16 = vld [vmem:[%s4685_s15 + $0x62c] sm:$0xf]  ;;  %v3458_v19 = vor.u32 %v3985_v14, %v3455_v15  ;;  %v3439_v38 = vld [vmem:[%s4685_s15 + $0x518] sm:$0xf0] }
 0x169   : > { %2478 = vmatpush.bf16.msrb.mxu0 %v3410_v4  ;;  %2491 = vmatpush.bf16.msrb.mxu1 %v3538_v5  ;;  %v2228_v4 = vpop.f32.mrf.mxu0  ;;  %v2241_v5 = vpop.f32.mrf.mxu1  ;;  %v3586_v22 = vor.u32 %v4017_v16, %v3583_v17  ;;  %v4013_v24 = vld [vmem:[%s4685_s15 + $0x60c] sm:$0xf] }
 0x16a   : > { %2504 = vmatpush.bf16.msrb.mxu2 %v3666_v9  ;;  %2517 = vmatpush.bf16.msrb.mxu3 %v3794_v10  ;;  %v2252_v61 = vpop.f32.mrf.mxu2  ;;  %v2265_v62 = vpop.f32.mrf.mxu3  ;;  %v3327_v9 = vld [vmem:[%s4685_s15 + $0x438] sm:$0xf0]  ;;  %v2572_v10 = vmul.f32 %v2568_v2, %v2568_v2  ;;  %v3570_v33 = vor.u32 %v4013_v24, %v3567_v27  ;;  %v2565_v55 = vld [vmem:[%s5252_s22 + $0x8] sm:$0xff] }
 0x16c   : > { %2576 = vst [vmem:[%s5272_s17] sm:$0xff] %v2572_v10 }
 0x16d   : > { %2479 = vmatpush.bf16.msrb.mxu0 %v3394_v35  ;;  %2492 = vmatpush.bf16.msrb.mxu1 %v3522_v36  ;;  %v3711_v35 = vld [vmem:[%s4685_s15 + $0x738] sm:$0xf0]  ;;  %v3330_v36 = vor.u32 %v3953_v8, %v3327_v9 }
 0x16e   : > { %2505 = vmatpush.bf16.msrb.mxu2 %v3650_v23  ;;  %2518 = vmatpush.bf16.msrb.mxu3 %v3778_v37  ;;  %v3714_v23 = vor.u32 %v4049_v18, %v3711_v35  ;;  %v3981_v37 = vld [vmem:[%s4685_s15 + $0x50c] sm:$0xf]  ;;  %v2546_v18 = vld [vmem:[%s4675_s27 + $0x10] sm:$0xff] }
 0x16f   : > { %v2554_v35 = vld [vmem:[%s5226_s25 + $0x10] sm:$0xff] }
 0x171   : > { %2480 = vmatpush.bf16.msrb.mxu0 %v3378_v31  ;;  %2493 = vmatpush.bf16.msrb.mxu1 %v3506_v32  ;;  %v3314_v31 = vor.u32 %v3949_v20, %v3311_v21  ;;  %v3442_v32 = vor.u32 %v3981_v37, %v3439_v38 }
 0x172   : > { %2506 = vmatpush.bf16.msrb.mxu2 %v3634_v39  ;;  %2519 = vmatpush.bf16.msrb.mxu3 %v3762_v40  ;;  %v2254_v25 = vpop.f32.mrf.mxu2  ;;  %v2267_v26 = vpop.f32.mrf.mxu3  ;;  %v2240_v39 = vadd.f32 %v5241_v30, %v5239_v12 }
 0x174   : > { %v2253_v40 = vadd.f32 %v2252_v61, %v2240_v39 }
 0x175   : > { %2481 = vmatpush.bf16.msrb.mxu0 %v3362_v49  ;;  %2494 = vmatpush.bf16.msrb.mxu1 %v3490_v50  ;;  %v2553_v50 = vld [vmem:[%s5226_s25 + $0x8] sm:$0xff] }
 0x176   : > { %2507 = vmatpush.bf16.msrb.mxu2 %v3618_v56  ;;  %2520 = vmatpush.bf16.msrb.mxu3 %v3746_v57  ;;  %v2266_v41 = vadd.f32 %v2265_v62, %v2253_v40 }
 0x179   : > { %2482 = vmatpush.bf16.msrb.mxu0 %v3346_v6  ;;  %2495 = vmatpush.bf16.msrb.mxu1 %v3474_v7 }
 0x17a   : > { %2508 = vmatpush.bf16.msrb.mxu2 %v3602_v11  ;;  %2521 = vmatpush.bf16.msrb.mxu3 %v3730_v13 }
 0x17d   : > { %2483 = vmatpush.bf16.msrb.mxu0 %v3330_v36  ;;  %2496 = vmatpush.bf16.msrb.mxu1 %v3458_v19 }
 0x17e   : > { %2509 = vmatpush.bf16.msrb.mxu2 %v3586_v22  ;;  %2522 = vmatpush.bf16.msrb.mxu3 %v3714_v23  ;;  %v2566_v22 = vld [vmem:[%s5252_s22 + $0x10] sm:$0xff] }
 0x181   : > { %2484 = vmatpush.bf16.msrb.mxu0 %v3314_v31  ;;  %2497 = vmatpush.bf16.msrb.mxu1 %v3442_v32  ;;  %v2278_v3 = vpop.f32.mrf.mxu0  ;;  %v2291_v42 = vpop.f32.mrf.mxu1 }
 0x182   : > { %2510 = vmatpush.bf16.msrb.mxu2 %v3570_v33  ;;  %2523 = vmatpush.bf16.msrb.mxu3 %v3698_v34  ;;  %v2279_v43 = vadd.f32 %v2278_v3, %v2266_v41 }
 0x184   : > { %2485 = vmatmul.bf16.vlgmr.msrb.gmra.mxu0 %v4890_v47  ;;  %2498 = vmatmul.bf16.vlgmr.msrb.gmra.mxu1 %v4892_v48  ;;  %v2292_v44 = vadd.f32 %v2291_v42, %v2279_v43  ;;  %v2545_v48 = vld [vmem:[%s4675_s27 + $0x8] sm:$0xff] }
 0x185   : > { %2511 = vmatmul.bf16.vlgmr.msrb.gmra.mxu2 %v4896_v52  ;;  %2524 = vmatmul.bf16.vlgmr.msrb.gmra.mxu3 %v4898_v53 }
 0x189   : > { %v2280_v47 = vpop.f32.mrf.mxu0  ;;  %v2293_v30 = vpop.f32.mrf.mxu1 }
 0x18a   : > { %v2304_v45 = vpop.f32.mrf.mxu2  ;;  %v2317_v46 = vpop.f32.mrf.mxu3  ;;  %v2547_v30 = vld [vmem:[%s4675_s27 + $0x18] sm:$0xff]  ;;  %s4385_s27 = scalar_lea.hbm %s4384_s24, 32 }
 0x18b   : > { %v2305_v12 = vadd.f32 %v2304_v45, %v2292_v44  ;;  %p4386_p2 = scmp.ne.s32.totalorder %s4384_s24, %s4385_s27  ;;  %p4391_p13 = scmp.lt.s32.totalorder %s4389_s4, %s4385_s27 }
 0x18d   : > { %v2318_v49 = vadd.f32 %v2317_v46, %v2305_v12  ;;  %p4387_p5 = pnand %p4386_p2, %p4563_p7  ;;  %p4392_p1 = por %p4391_p13, %p4390_p12 }
 0x18f   : > { %v2549_v51 = vadd.f32 %v2545_v48, %v2318_v49  ;;  %v2555_v49 = vld [vmem:[%s5226_s25 + $0x18] sm:$0xff]  ;;  %p4388_p10 = pneg %p4387_p5 }
 0x191   : > { %v2557_v53 = vadd.f32 %v2553_v50, %v2549_v51  ;;  %p4393_p3 = pnand %p4392_p1, %p4388_p10 }
 0x192   : > { %v2306_v52 = vpop.f32.mrf.mxu2  ;;  %v2319_v54 = vpop.f32.mrf.mxu3 }
 0x193   : > { %4183 = vtanh.f32 %v2557_v53  ;;  %v2567_v54 = vld [vmem:[%s5252_s22 + $0x18] sm:$0xff] }
 0x199   : > { %v4184_v56 = vpop.eup %4183 }
 0x19a   : > { %v2569_v57 = vsub.f32 %v4184_v56, %v2565_v55 }
 0x19c   : > { %v2573_v58 = vmul.f32 %v2569_v57, %v2569_v57 }
 0x19e   : > { %2577 = vst [vmem:[%s5272_s17 + $0x8] sm:$0xff] %v2573_v58 }
 0x1a1   : > { %v2330_v59 = vpop.f32.mrf.mxu0  ;;  %v2343_v60 = vpop.f32.mrf.mxu1 }
 0x1a2   : > { %v2344_v4 = vadd.f32 %v2343_v60, %v2330_v59 }
 0x1a9   : > { %v2332_v63 = vpop.f32.mrf.mxu0  ;;  %v2345_v0 = vpop.f32.mrf.mxu1 }
 0x1aa   : > { %v2356_v61 = vpop.f32.mrf.mxu2  ;;  %v2369_v62 = vpop.f32.mrf.mxu3 }
 0x1ab   : > { %v2357_v5 = vadd.f32 %v2356_v61, %v2344_v4 }
 0x1ad   : > { %v2370_v6 = vadd.f32 %v2369_v62, %v2357_v5 }
 0x1b2   : > { %v2358_v1 = vpop.f32.mrf.mxu2  ;;  %v2371_v2 = vpop.f32.mrf.mxu3 }
 0x1c1   : > { %v2382_v7 = vpop.f32.mrf.mxu0  ;;  %v2395_v8 = vpop.f32.mrf.mxu1 }
 0x1c2   : > { %v2383_v9 = vadd.f32 %v2382_v7, %v2370_v6 }
 0x1c4   : > { %v2396_v10 = vadd.f32 %v2395_v8, %v2383_v9 }
 0x1c9   : > { %v2384_v15 = vpop.f32.mrf.mxu0  ;;  %v2397_v16 = vpop.f32.mrf.mxu1 }
 0x1ca   : > { %v2408_v11 = vpop.f32.mrf.mxu2  ;;  %v2421_v13 = vpop.f32.mrf.mxu3 }
 0x1cb   : > { %v2409_v14 = vadd.f32 %v2408_v11, %v2396_v10 }
 0x1cd   : > { %v2422_v17 = vadd.f32 %v2421_v13, %v2409_v14 }
 0x1cf   : > { %v2550_v36 = vadd.f32 %v2546_v18, %v2422_v17 }
 0x1d1   : > { %v2558_v21 = vadd.f32 %v2554_v35, %v2550_v36 }
 0x1d2   : > { %v2410_v19 = vpop.f32.mrf.mxu2  ;;  %v2423_v20 = vpop.f32.mrf.mxu3 }
 0x1d3   : > { %4185 = vtanh.f32 %v2558_v21 }
 0x1d9   : > { %v4186_v23 = vpop.eup %4185 }
 0x1da   : > { %v2570_v37 = vsub.f32 %v4186_v23, %v2566_v22 }
 0x1dc   : > { %v2574_v38 = vmul.f32 %v2570_v37, %v2570_v37 }
 0x1de   : > { %2578 = vst [vmem:[%s5272_s17 + $0x10] sm:$0xff] %v2574_v38 }
 0x1e1   : > { %v2434_v24 = vpop.f32.mrf.mxu0  ;;  %v2447_v25 = vpop.f32.mrf.mxu1 }
 0x1e2   : > { %v2448_v33 = vadd.f32 %v2447_v25, %v2434_v24 }
 0x1e9   : > { %v2436_v28 = vpop.f32.mrf.mxu0  ;;  %v2449_v29 = vpop.f32.mrf.mxu1 }
 0x1ea   : > { %v2460_v26 = vpop.f32.mrf.mxu2  ;;  %v2473_v27 = vpop.f32.mrf.mxu3 }
 0x1eb   : > { %v2461_v34 = vadd.f32 %v2460_v26, %v2448_v33 }
 0x1ed   : > { %v2474_v39 = vadd.f32 %v2473_v27, %v2461_v34 }
 0x1f2   : > { %v2462_v31 = vpop.f32.mrf.mxu2  ;;  %v2475_v32 = vpop.f32.mrf.mxu3 }
 0x201   : > { %v2486_v40 = vpop.f32.mrf.mxu0  ;;  %v2499_v41 = vpop.f32.mrf.mxu1 }
 0x202   : > { %v2487_v3 = vadd.f32 %v2486_v40, %v2474_v39 }
 0x204   : > { %v2500_v42 = vadd.f32 %v2499_v41, %v2487_v3 }
 0x208   : > { %v2512_v43 = vpop.f32.mrf.mxu2  ;;  %v2525_v44 = vpop.f32.mrf.mxu3 }
 0x209   : > { %v2513_v45 = vadd.f32 %v2512_v43, %v2500_v42  ;;  %v2488_v46 = vpop.f32.mrf.mxu0  ;;  %v2501_v12 = vpop.f32.mrf.mxu1 }
 0x20b   : > { %v2526_v47 = vadd.f32 %v2525_v44, %v2513_v45 }
 0x20d   : > { %v2551_v48 = vadd.f32 %v2547_v30, %v2526_v47 }
 0x20f   : > { %v2559_v52 = vadd.f32 %v2555_v49, %v2551_v48 }
 0x210   : > { %v2514_v50 = vpop.f32.mrf.mxu2  ;;  %v2527_v51 = vpop.f32.mrf.mxu3 }
 0x211   : > { %4187 = vtanh.f32 %v2559_v52 }
 0x217   : > { %v4188_v53 = vpop.eup %4187 }
 0x218   : > { %v2571_v55 = vsub.f32 %v4188_v53, %v2567_v54 }
 0x21a   : > { %v2575_v56 = vmul.f32 %v2571_v55, %v2571_v55 }
 0x21c   : > { %2579 = vst [vmem:[%s5272_s17 + $0x18] sm:$0xff] %v2575_v56 }
 0x21d   : > { %4396 = shalt.err (!%p4393_p3)
}
 0x21e   : > { %4093 = dma.vmem_to_hbm [thread:$0]  (%p4563_p7), %s2595_s29, 512, %s2597_s23, %s2581_s20  }
 0x21f PF: > { %s5376_s2 = sld [smem:[#allocation16_spill]]  ;;  %p4116_p4 = pnand %p2766_p11, %p4567_p8 }
 0x221   : > { %p4117_p6 = pneg %p4116_p4 }
 0x225   : > { %s2608_s16 = sand.u32 1, %s5376_s2  }
 0x226   : > { %s2609_s25 = scalar_lea.sflag [#allocation4], %s2608_s16 }
 0x227   : > { %4434 = dma.done.wait (%p4117_p6), %s2609_s25, 512  }
 0x228   : > { %4436 = vsyncadd (%p4117_p6), %s2609_s25, 4294966784  ;;  %s23_s10 = sadd.s32 1, %s4459_s10   ;;  %s5378_s22 = sld [smem:[#allocation17_spill]] }
 0x229   : > { %p20_p9 = scmp.ge.s32.totalorder %s23_s10, 4   ;;  %s5379_s29 = sld [smem:[#allocation21_spill]] }
 0x22a   : > { %s5380_s17 = sld [smem:[#allocation20_spill]]  ;;  %s5381_s27 = smov %s4443_s28 }
 0x22b   : > { %s5383_s30 = smov %s4455_s9 }
 0x22c   :  { %22 = sbr.rel (!%p20_p9) target bundleno = 10 (0xa), region = 147 }
 0x22e   : > { %s5382_s28 = smov %s5378_s22 }
 0x230   : > { %s5384_s9 = smov %s5380_s17 }
 0x231   :  { %2615 = vsyncpa [#allocation3], 1 }
 0x232   :  { %2617 = vsyncpa [#allocation3 + $0x1], 1 }
 0x233   :  { %2618 = vsyncpa [#allocation6], 1 }
 0x234   :  { %2619 = vsyncpa [#allocation4], 1 }
 0x235   :  { %2621 = vsyncpa [#allocation4 + $0x1], 1 }

</bundles_post_ra>
